<compile_context>
chip_gen: v5e
topology: v5e:2x2
jax: 0.10.0
libtpu: 0.0.40
codegen_flags: <defaults>
</compile_context>

<pallas_src>
import functools
import math

import jax
import jax.numpy as jnp
from jax.experimental import pallas as pl
from jax.experimental.pallas import tpu as pltpu

_INV_SQRT2 = 1.0 / math.sqrt(2.0)
_MIB = 1024 * 1024


def _round_up(a, b):
    return (a + b - 1) // b * b


def _vmem_capacity_bytes():
    try:
        return int(pltpu.get_tpu_info().vmem_capacity_bytes)
    except Exception:
        return 64 * _MIB  # conservative default (v7x per-TensorCore)


def _mlp_kernel(x_ref, w1_ref, b1_ref, w2_ref, b2_ref, o_ref, *, approximate_gelu):
    # x_ref:  (Cin,  tile_hw)  pixel tile; channels on sublanes, pixels on lanes
    # w1_ref: (Chid, Cin)      fc1 weight, resident across the grid
    # b1_ref: (Chid, 1)
    # w2_ref: (Cout, Chid)     fc2 weight, resident across the grid
    # b2_ref: (Cout, 1)
    # o_ref:  (Cout, tile_hw)
    # Native-dtype operands straight into the MXU; accumulate in f32.
    h = jnp.dot(w1_ref[...], x_ref[...], preferred_element_type=jnp.float32)
    h = h + b1_ref[...]
    if approximate_gelu:
        # tanh-approx GELU: transcendental goes to the EUP slot (cheaper on VPU).
        g = jax.nn.gelu(h, approximate=True)
    else:
        # Exact GELU (matches torch.nn.GELU() default, approximate='none').
        g = 0.5 * h * (1.0 + jax.lax.erf(h * _INV_SQRT2))
    o = jnp.dot(w2_ref[...], g.astype(w2_ref.dtype),
                preferred_element_type=jnp.float32)
    o = o + b2_ref[...]
    # Dropout with p=0.0 is the identity -> no-op.
    o_ref[...] = o.astype(o_ref.dtype)


def _resident_spec(shape, buffered_single):
    """BlockSpec for a grid-invariant operand (always block index 0)."""
    index_map = lambda n, j, _nd=len(shape): (0,) * _nd
    if buffered_single:
        return pl.BlockSpec(shape, index_map, pipeline_mode=pl.Buffered(1))
    return pl.BlockSpec(shape, index_map)


def mlp_pallas(x_nchw, w1, b1, w2, b2, *, tile_hw=None, approximate_gelu=False,
               compute_dtype=None):
    """x_nchw: (N, Cin, H, W).  w1: (Chid, Cin, 1, 1), b1: (Chid,),
    w2: (Cout, Chid, 1, 1), b2: (Cout,).  Returns (N, Cout, H, W)."""
    N, Cin, H, W = x_nchw.shape
    Chid = w1.shape[0]
    Cout = w2.shape[0]
    HW = H * W
    out_dtype = x_nchw.dtype

    # Free (contiguous) reshape: NCHW -> (N, Cin, H*W).  No transpose passes.
    x3d = x_nchw.reshape(N, Cin, HW)

    # Conv2d 1x1 weights (out, in, 1, 1) -> (out, in); biases as column vectors
    # so they broadcast over the lane (pixel) axis.
    w1_mat = w1.reshape(Chid, Cin)
    w2_mat = w2.reshape(Cout, Chid)
    b1_col = b1.reshape(Chid, 1)
    b2_col = b2.reshape(Cout, 1)

    if compute_dtype is not None:
        x3d = x3d.astype(compute_dtype)
        w1_mat = w1_mat.astype(compute_dtype)
        w2_mat = w2_mat.astype(compute_dtype)

    itemsize = jnp.dtype(x3d.dtype).itemsize

    # --- generation-aware VMEM budget and tile selection ------------------
    vmem_cap = _vmem_capacity_bytes()
    vmem_budget = int(vmem_cap * 3 // 4)          # headroom for compiler scratch

    if tile_hw is None:
        tile_hw = 2048 if vmem_cap > 96 * _MIB else 1024
    tile_hw = max(128, _round_up(tile_hw, 128))
    tile_hw = min(tile_hw, _round_up(HW, 128))    # don't exceed (padded) extent

    # Megacore guard (v7x has 2 TCs): make sure the parallel grid has >= 2 steps.
    if N == 1 and HW > 128 and pl.cdiv(HW, tile_hw) < 2:
        tile_hw = _round_up(pl.cdiv(HW, 2), 128)

    def _footprint(t):
        return (2 * (Cin + Cout) * t * itemsize                       # dbl-buf x/out
                + (Chid * Cin + Cout * Chid + Chid + Cout) * itemsize  # resident weights
                + 3 * Chid * t * 4)                                    # f32 hidden + GELU temps

    # Shrink the pixel tile (never the channel dims) until it fits the budget.
    while tile_hw > 128 and 2 * _footprint(tile_hw) > vmem_budget:
        tile_hw -= 128

    vmem_limit = int(min(max(2 * _footprint(tile_hw), 32 * _MIB), vmem_budget))

    grid = (N, pl.cdiv(HW, tile_hw))   # ragged last block handled by Pallas

    weight_bytes = (Chid * Cin + Cout * Chid + Chid + Cout) * itemsize
    cost = pl.CostEstimate(
        flops=2 * N * HW * (Cin * Chid + Chid * Cout),
        transcendentals=N * HW * Chid,
        bytes_accessed=itemsize * N * HW * (Cin + Cout) + weight_bytes,
    )

    kernel = functools.partial(_mlp_kernel, approximate_gelu=approximate_gelu)

    def _run(buffered_single):
        return pl.pallas_call(
            kernel,
            out_shape=jax.ShapeDtypeStruct((N, Cout, HW), out_dtype),
            grid_spec=pltpu.PrefetchScalarGridSpec(
                num_scalar_prefetch=0,
                grid=grid,
                in_specs=[
                    # x tile: batch dim squeezed, channels x pixel-tile (lane-dense).
                    pl.BlockSpec((None, Cin, tile_hw), lambda n, j: (n, 0, j)),
                    _resident_spec((Chid, Cin), buffered_single),   # fc1 weight
                    _resident_spec((Chid, 1), buffered_single),     # fc1 bias
                    _resident_spec((Cout, Chid), buffered_single),  # fc2 weight
                    _resident_spec((Cout, 1), buffered_single),     # fc2 bias
                ],
                out_specs=pl.BlockSpec((None, Cout, tile_hw),
                                       lambda n, j: (n, 0, j)),
            ),
            compiler_params=pltpu.CompilerParams(
                dimension_semantics=("parallel", "parallel"),
                vmem_limit_bytes=vmem_limit),
            cost_estimate=cost,
        )(x3d, w1_mat, b1_col, w2_mat, b2_col)

    try:
        out3d = _run(buffered_single=True)
    except Exception:
        # Fallback: default double-buffered resident weights (known-good path).
        out3d = _run(buffered_single=False)

    # Free reshape back: (N, Cout, H*W) -> NCHW.
    return out3d.reshape(N, Cout, H, W)


def _mlp_reference(x_nchw, w1, b1, w2, b2):
    Chid, Cout = w1.shape[0], w2.shape[0]
    x = x_nchw.astype(jnp.float32)
    h = jnp.einsum("oc,nchw->nohw", w1.reshape(Chid, -1).astype(jnp.float32), x)
    h = h + b1.astype(jnp.float32).reshape(1, Chid, 1, 1)
    h = 0.5 * h * (1.0 + jax.lax.erf(h * _INV_SQRT2))
    o = jnp.einsum("oc,nchw->nohw", w2.reshape(Cout, -1).astype(jnp.float32), h)
    o = o + b2.astype(jnp.float32).reshape(1, Cout, 1, 1)
    return o.astype(x_nchw.dtype)


if __name__ == "__main__":
    # Small shapes consistent with the module: NCHW input, 1x1 convs.
    N, Cin, H, W = 2, 4, 16, 16
    Chid = 32          # hidden_features
    Cout = Cin         # out_features defaults to in_features

    key = jax.random.PRNGKey(0)
    k_x, k_w1, k_b1, k_w2, k_b2 = jax.random.split(key, 5)

    x = jax.random.normal(k_x, (N, Cin, H, W), dtype=jnp.float32)

    # Deterministic parameter init (Conv2d-style uniform bounds).
    bound1 = 1.0 / math.sqrt(Cin)
    w1 = jax.random.uniform(k_w1, (Chid, Cin, 1, 1), minval=-bound1,
                            maxval=bound1, dtype=jnp.float32)
    b1 = jax.random.uniform(k_b1, (Chid,), minval=-bound1, maxval=bound1,
                            dtype=jnp.float32)
    bound2 = 1.0 / math.sqrt(Chid)
    w2 = jax.random.uniform(k_w2, (Cout, Chid, 1, 1), minval=-bound2,
                            maxval=bound2, dtype=jnp.float32)
    b2 = jax.random.uniform(k_b2, (Cout,), minval=-bound2, maxval=bound2,
                            dtype=jnp.float32)

    out = mlp_pallas(x, w1, b1, w2, b2)
    out = jax.block_until_ready(out)

    ref = _mlp_reference(x, w1, b1, w2, b2)
    assert out.shape == (N, Cout, H, W)
    assert jnp.allclose(out, ref, atol=1e-4, rtol=1e-4)

    print("KERNEL_OK")
</pallas_src>

<mosaic_0001>
module attributes {stable_mosaic.version = 11 : i64} {
  func.func @_mlp_kernel(%arg0: i32, %arg1: i32, %arg2: memref<1x4x256xf32, #tpu.memory_space<vmem>>, %arg3: memref<32x4xf32, #tpu.memory_space<vmem>>, %arg4: memref<32x1xf32, #tpu.memory_space<vmem>>, %arg5: memref<4x32xf32, #tpu.memory_space<vmem>>, %arg6: memref<4x1xf32, #tpu.memory_space<vmem>>, %arg7: memref<1x4x256xf32, #tpu.memory_space<vmem>>) attributes {dimension_semantics = [#tpu.dimension_semantics<parallel>, #tpu.dimension_semantics<parallel>], iteration_bounds = array<i64: 2, 1>, scalar_prefetch = 0 : i64, scratch_operands = 0 : i64, tpu.core_type = #tpu.core_type<tc>, window_params = [{transform_indices = @transform_0, window_bounds = array<i64: 1, 4, 256>}, {pipeline_mode = #tpu.pipeline_mode<synchronous>, transform_indices = @transform_1, window_bounds = array<i64: 32, 4>}, {pipeline_mode = #tpu.pipeline_mode<synchronous>, transform_indices = @transform_2, window_bounds = array<i64: 32, 1>}, {pipeline_mode = #tpu.pipeline_mode<synchronous>, transform_indices = @transform_3, window_bounds = array<i64: 4, 32>}, {pipeline_mode = #tpu.pipeline_mode<synchronous>, transform_indices = @transform_4, window_bounds = array<i64: 4, 1>}, {transform_indices = @transform_5, window_bounds = array<i64: 1, 4, 256>}]} {
    %c0 = arith.constant 0 : index
    %c0_0 = arith.constant 0 : index
    %0 = vector.load %arg3[%c0, %c0_0] : memref<32x4xf32, #tpu.memory_space<vmem>>, vector<32x4xf32>
    %c0_1 = arith.constant 0 : index
    %c0_2 = arith.constant 0 : index
    %c0_3 = arith.constant 0 : index
    %1 = vector.load %arg2[%c0_1, %c0_2, %c0_3] : memref<1x4x256xf32, #tpu.memory_space<vmem>>, vector<1x4x256xf32>
    %2 = vector.shape_cast %1 : vector<1x4x256xf32> to vector<4x256xf32>
    %cst = arith.constant dense<0.000000e+00> : vector<32x256xf32>
    %3 = tpu.matmul %0, %2, %cst {dimension_numbers = #tpu.dot_dimension_numbers<[1], [0], [0], [1], [0, 0, 1, 1], [], []>} : vector<32x4xf32>, vector<4x256xf32>, vector<32x256xf32> -> vector<32x256xf32>
    %c0_4 = arith.constant 0 : index
    %c0_5 = arith.constant 0 : index
    %4 = vector.load %arg4[%c0_4, %c0_5] : memref<32x1xf32, #tpu.memory_space<vmem>>, vector<32x1xf32>
    %5 = vector.broadcast %4 : vector<32x1xf32> to vector<32x256xf32>
    %6 = arith.addf %3, %5 : vector<32x256xf32>
    %cst_6 = arith.constant 5.000000e-01 : f32
    %7 = vector.broadcast %cst_6 : f32 to vector<32x256xf32>
    %8 = arith.mulf %7, %6 : vector<32x256xf32>
    %cst_7 = arith.constant 0.707106769 : f32
    %9 = vector.broadcast %cst_7 : f32 to vector<32x256xf32>
    %10 = arith.mulf %6, %9 : vector<32x256xf32>
    %11 = math.erf %10 : vector<32x256xf32>
    %cst_8 = arith.constant 1.000000e+00 : f32
    %12 = vector.broadcast %cst_8 : f32 to vector<32x256xf32>
    %13 = arith.addf %12, %11 : vector<32x256xf32>
    %14 = arith.mulf %8, %13 : vector<32x256xf32>
    %c0_9 = arith.constant 0 : index
    %c0_10 = arith.constant 0 : index
    %15 = vector.load %arg5[%c0_9, %c0_10] : memref<4x32xf32, #tpu.memory_space<vmem>>, vector<4x32xf32>
    %cst_11 = arith.constant dense<0.000000e+00> : vector<4x256xf32>
    %16 = tpu.matmul %15, %14, %cst_11 {dimension_numbers = #tpu.dot_dimension_numbers<[1], [0], [0], [1], [0, 0, 1, 1], [], []>} : vector<4x32xf32>, vector<32x256xf32>, vector<4x256xf32> -> vector<4x256xf32>
    %c0_12 = arith.constant 0 : index
    %c0_13 = arith.constant 0 : index
    %17 = vector.load %arg6[%c0_12, %c0_13] : memref<4x1xf32, #tpu.memory_space<vmem>>, vector<4x1xf32>
    %18 = vector.broadcast %17 : vector<4x1xf32> to vector<4x256xf32>
    %19 = arith.addf %16, %18 : vector<4x256xf32>
    %c0_14 = arith.constant 0 : index
    %c0_15 = arith.constant 0 : index
    %c0_16 = arith.constant 0 : index
    %20 = vector.load %arg7[%c0_14, %c0_15, %c0_16] : memref<1x4x256xf32, #tpu.memory_space<vmem>>, vector<1x4x256xf32>
    %21 = vector.shape_cast %20 : vector<1x4x256xf32> to vector<4x256xf32>
    %22 = vector.shape_cast %19 : vector<4x256xf32> to vector<1x4x256xf32>
    tpu.vector_store %arg7[%c0_14, %c0_15, %c0_16], %22 {strides = array<i32>} : memref<1x4x256xf32, #tpu.memory_space<vmem>>, vector<1x4x256xf32>,
    return
  }
  func.func @transform_0(%arg0: i32, %arg1: i32) -> (i32, i32, i32) {
    %c0_i32 = arith.constant 0 : i32
    %c0_i32_0 = arith.constant 0 : i32
    return %arg0, %c0_i32, %arg1 : i32, i32, i32
  }
  func.func @transform_1(%arg0: i32, %arg1: i32) -> (i32, i32) {
    %c0_i32 = arith.constant 0 : i32
    %c0_i32_0 = arith.constant 0 : i32
    %c0_i32_1 = arith.constant 0 : i32
    return %c0_i32, %c0_i32_0 : i32, i32
  }
  func.func @transform_2(%arg0: i32, %arg1: i32) -> (i32, i32) {
    %c0_i32 = arith.constant 0 : i32
    %c0_i32_0 = arith.constant 0 : i32
    %c0_i32_1 = arith.constant 0 : i32
    return %c0_i32, %c0_i32_0 : i32, i32
  }
  func.func @transform_3(%arg0: i32, %arg1: i32) -> (i32, i32) {
    %c0_i32 = arith.constant 0 : i32
    %c0_i32_0 = arith.constant 0 : i32
    %c0_i32_1 = arith.constant 0 : i32
    return %c0_i32, %c0_i32_0 : i32, i32
  }
  func.func @transform_4(%arg0: i32, %arg1: i32) -> (i32, i32) {
    %c0_i32 = arith.constant 0 : i32
    %c0_i32_0 = arith.constant 0 : i32
    %c0_i32_1 = arith.constant 0 : i32
    return %c0_i32, %c0_i32_0 : i32, i32
  }
  func.func @transform_5(%arg0: i32, %arg1: i32) -> (i32, i32, i32) {
    %c0_i32 = arith.constant 0 : i32
    %c0_i32_0 = arith.constant 0 : i32
    return %arg0, %c0_i32, %arg1 : i32, i32, i32
  }
}

module attributes {stable_mosaic.version = 11 : i64} {
  func.func @_mlp_kernel(%arg0: i32, %arg1: i32, %arg2: memref<1x4x256xf32, #tpu.memory_space<vmem>>, %arg3: memref<32x4xf32, #tpu.memory_space<vmem>>, %arg4: memref<32x1xf32, #tpu.memory_space<vmem>>, %arg5: memref<4x32xf32, #tpu.memory_space<vmem>>, %arg6: memref<4x1xf32, #tpu.memory_space<vmem>>, %arg7: memref<1x4x256xf32, #tpu.memory_space<vmem>>) attributes {dimension_semantics = [#tpu.dimension_semantics<parallel>, #tpu.dimension_semantics<parallel>], iteration_bounds = array<i64: 2, 1>, scalar_prefetch = 0 : i64, scratch_operands = 0 : i64, tpu.core_type = #tpu.core_type<tc>, window_params = [{transform_indices = @transform_0, window_bounds = array<i64: 1, 4, 256>}, {pipeline_mode = #tpu.pipeline_mode<synchronous>, transform_indices = @transform_1, window_bounds = array<i64: 32, 4>}, {pipeline_mode = #tpu.pipeline_mode<synchronous>, transform_indices = @transform_2, window_bounds = array<i64: 32, 1>}, {pipeline_mode = #tpu.pipeline_mode<synchronous>, transform_indices = @transform_3, window_bounds = array<i64: 4, 32>}, {pipeline_mode = #tpu.pipeline_mode<synchronous>, transform_indices = @transform_4, window_bounds = array<i64: 4, 1>}, {transform_indices = @transform_5, window_bounds = array<i64: 1, 4, 256>}]} {
    %c0 = arith.constant 0 : index
    %c0_0 = arith.constant 0 : index
    %0 = vector.load %arg3[%c0, %c0_0] : memref<32x4xf32, #tpu.memory_space<vmem>>, vector<32x4xf32>
    %c0_1 = arith.constant 0 : index
    %c0_2 = arith.constant 0 : index
    %c0_3 = arith.constant 0 : index
    %1 = vector.load %arg2[%c0_1, %c0_2, %c0_3] : memref<1x4x256xf32, #tpu.memory_space<vmem>>, vector<1x4x256xf32>
    %2 = vector.shape_cast %1 : vector<1x4x256xf32> to vector<4x256xf32>
    %cst = arith.constant dense<0.000000e+00> : vector<32x256xf32>
    %3 = tpu.matmul %0, %2, %cst {dimension_numbers = #tpu.dot_dimension_numbers<[1], [0], [0], [1], [0, 0, 1, 1], [], []>} : vector<32x4xf32>, vector<4x256xf32>, vector<32x256xf32> -> vector<32x256xf32>
    %c0_4 = arith.constant 0 : index
    %c0_5 = arith.constant 0 : index
    %4 = vector.load %arg4[%c0_4, %c0_5] : memref<32x1xf32, #tpu.memory_space<vmem>>, vector<32x1xf32>
    %5 = vector.broadcast %4 : vector<32x1xf32> to vector<32x256xf32>
    %6 = arith.addf %3, %5 : vector<32x256xf32>
    %cst_6 = arith.constant 5.000000e-01 : f32
    %7 = vector.broadcast %cst_6 : f32 to vector<32x256xf32>
    %8 = arith.mulf %7, %6 : vector<32x256xf32>
    %cst_7 = arith.constant 0.707106769 : f32
    %9 = vector.broadcast %cst_7 : f32 to vector<32x256xf32>
    %10 = arith.mulf %6, %9 : vector<32x256xf32>
    %11 = math.erf %10 : vector<32x256xf32>
    %cst_8 = arith.constant 1.000000e+00 : f32
    %12 = vector.broadcast %cst_8 : f32 to vector<32x256xf32>
    %13 = arith.addf %12, %11 : vector<32x256xf32>
    %14 = arith.mulf %8, %13 : vector<32x256xf32>
    %c0_9 = arith.constant 0 : index
    %c0_10 = arith.constant 0 : index
    %15 = vector.load %arg5[%c0_9, %c0_10] : memref<4x32xf32, #tpu.memory_space<vmem>>, vector<4x32xf32>
    %cst_11 = arith.constant dense<0.000000e+00> : vector<4x256xf32>
    %16 = tpu.matmul %15, %14, %cst_11 {dimension_numbers = #tpu.dot_dimension_numbers<[1], [0], [0], [1], [0, 0, 1, 1], [], []>} : vector<4x32xf32>, vector<32x256xf32>, vector<4x256xf32> -> vector<4x256xf32>
    %c0_12 = arith.constant 0 : index
    %c0_13 = arith.constant 0 : index
    %17 = vector.load %arg6[%c0_12, %c0_13] : memref<4x1xf32, #tpu.memory_space<vmem>>, vector<4x1xf32>
    %18 = vector.broadcast %17 : vector<4x1xf32> to vector<4x256xf32>
    %19 = arith.addf %16, %18 : vector<4x256xf32>
    %c0_14 = arith.constant 0 : index
    %c0_15 = arith.constant 0 : index
    %c0_16 = arith.constant 0 : index
    %20 = vector.load %arg7[%c0_14, %c0_15, %c0_16] : memref<1x4x256xf32, #tpu.memory_space<vmem>>, vector<1x4x256xf32>
    %21 = vector.shape_cast %20 : vector<1x4x256xf32> to vector<4x256xf32>
    %22 = vector.shape_cast %19 : vector<4x256xf32> to vector<1x4x256xf32>
    tpu.vector_store %arg7[%c0_14, %c0_15, %c0_16], %22 {strides = array<i32>} : memref<1x4x256xf32, #tpu.memory_space<vmem>>, vector<1x4x256xf32>,
    return
  }
  func.func @transform_0(%arg0: i32, %arg1: i32) -> (i32, i32, i32) {
    %c0_i32 = arith.constant 0 : i32
    %c0_i32_0 = arith.constant 0 : i32
    return %arg0, %c0_i32, %arg1 : i32, i32, i32
  }
  func.func @transform_1(%arg0: i32, %arg1: i32) -> (i32, i32) {
    %c0_i32 = arith.constant 0 : i32
    %c0_i32_0 = arith.constant 0 : i32
    %c0_i32_1 = arith.constant 0 : i32
    return %c0_i32, %c0_i32_0 : i32, i32
  }
  func.func @transform_2(%arg0: i32, %arg1: i32) -> (i32, i32) {
    %c0_i32 = arith.constant 0 : i32
    %c0_i32_0 = arith.constant 0 : i32
    %c0_i32_1 = arith.constant 0 : i32
    return %c0_i32, %c0_i32_0 : i32, i32
  }
  func.func @transform_3(%arg0: i32, %arg1: i32) -> (i32, i32) {
    %c0_i32 = arith.constant 0 : i32
    %c0_i32_0 = arith.constant 0 : i32
    %c0_i32_1 = arith.constant 0 : i32
    return %c0_i32, %c0_i32_0 : i32, i32
  }
  func.func @transform_4(%arg0: i32, %arg1: i32) -> (i32, i32) {
    %c0_i32 = arith.constant 0 : i32
    %c0_i32_0 = arith.constant 0 : i32
    %c0_i32_1 = arith.constant 0 : i32
    return %c0_i32, %c0_i32_0 : i32, i32
  }
  func.func @transform_5(%arg0: i32, %arg1: i32) -> (i32, i32, i32) {
    %c0_i32 = arith.constant 0 : i32
    %c0_i32_0 = arith.constant 0 : i32
    return %arg0, %c0_i32, %arg1 : i32, i32, i32
  }
}

</mosaic_0001>

<bundles_post_ra>
// kernel: tpu_custom_call.1
= control target key start
LH: loop header
LB: loop body
LE: loop exit
PB: predicated region body
PF: predicated region fallthrough
CT: control target
= control target key end

     0   :  { %10 = vsyncpa [#allocation3], 0  ;;  %s1523_s0 = inlined_call_operand.vmem [shape: f32[2,4,256], index: 0, kind: input, shape index: {}]   ;;  %s1524_s1 = inlined_call_operand.vmem [shape: f32[32,4], index: 1, kind: input, shape index: {}]   ;;  %s1525_s2 = inlined_call_operand.vmem [shape: f32[32,1], index: 2, kind: input, shape index: {}]   ;;  %s1526_s3 = inlined_call_operand.vmem [shape: f32[4,32], index: 3, kind: input, shape index: {}]   ;;  %s1527_s4 = inlined_call_operand.vmem [shape: f32[4,1], index: 4, kind: input, shape index: {}]   ;;  %s1528_s5 = inlined_call_operand.hbm [shape: f32[2,4,256], index: 5, kind: output, shape index: {}]  }
   0x1   :  { %12 = vsyncpa [#allocation3 + $0x1], 0  ;;  %s1090_s18 = smov 0   ;;  %s1092_s19 = smov 0  }
   0x2   :  { %s1094_s20 = smov 0   ;;  %s1096_s21 = smov 0  }
   0x3   :  { %s1098_s22 = smov 0   ;;  %s1100_s23 = smov 0  }
   0x4 LB: > { %s867_s24 = sadd.s32 4294967295, %s1057_s23   ;;  %s868_s25 = sadd.s32 4294967294, %s1057_s23   ;;  %s1057_s23 = sphi %s1100_s23, %s18_s23   ;;  %s1053_s22 = sphi %s1098_s22, %s1545_s22   ;;  %s1049_s21 = sphi %s1096_s21, %s1544_s21   ;;  %s1045_s20 = sphi %s1094_s20, %s1543_s20   ;;  %s1041_s19 = sphi %s1092_s19, %s1542_s19   ;;  %s1037_s18 = sphi %s1090_s18, %s1541_s18  }
   0x5   : > { %s30_s26 = sadd.s32 1, %s1053_s22  ;;  %s151_s27 = sadd.s32 1, %s1045_s20 }
   0x6   : > { %p32_p0 = scmp.ge.s32.totalorder %s30_s26, 2  ;;  %p161_p1 = scmp.ne.s32.totalorder %s1045_s20, %s1041_s19 }
   0x7   : > { %p162_p2 = scmp.eq.s32.totalorder %s867_s24, 1  ;;  %p167_p3 = scmp.ne.s32.totalorder %s1041_s19, %s1037_s18 }
   0x8   : > { %s1547_s26 = smov (%p32_p0, %s30_s26), 0  ;;  %p168_p5 = scmp.eq.s32.totalorder %s868_s25, 1 }
   0x9   : > { %p1130_p4 = por %p162_p2, %p161_p1  ;;  %s146_s29 = ssub.s32 %s1053_s22, %s1547_s26 }
   0xa   : > { %p871_p6 = scmp.ge.s32.totalorder %s1057_s23, 1  ;;  %p149_p7 = scmp.eq.s32.totalorder %s146_s29, 0 }
   0xb   : > { %p1137_p8 = por %p168_p5, %p167_p3  ;;  %p211_p9 = scmp.lt.s32.totalorder %s1057_s23, 3 }
   0xc   : > { %s1143_s6 = scalar_select %p149_p7, %s1045_s20, %s151_s27  }
   0xd   : > { %p212_p10 = pnand %p871_p6, %p211_p9 }
   0xe   : > { %p244_p11 = scmp.lt.s32.totalorder (!%p212_p10), %s1049_s21, 1  ;;  %s240_s17 = sand.u32 (!%p212_p10), 1, %s1041_s19  }
   0xf   : > { %215 = sbr.rel (%p212_p10) target bundleno = 414 (0x19e), region = 40  ;;  %s872_s24 = sshll.u32 (!%p212_p10), %s240_s17, 3 }
  0x10   : > { %s901_s25 = sshll.u32 (!%p212_p10), %s1049_s21, 3  ;;  %s242_s8 = scalar_lea.vmem (!%p212_p10), [#allocation2], %s872_s24 }
  0x11   : > { %s786_s7 = scalar_lea.hbm (!%p212_p10), %s1528_s5, %s901_s25  ;;  %s788_s9 = sshll.u32 (!%p212_p10), %s242_s8, 4  ;;  %s789_s9 = int_to_ptr.vmem [resolvable:$true] %s788_s9 }
  0x12   : > { %s790_s10 = sshll.u32 (!%p212_p10), %s786_s7, 4  ;;  %s791_s10 = int_to_ptr.hbm [resolvable:$true] %s790_s10 }
  0x14   : > { %v1059_v0 = vmov 0   ;;  %v260_v1 = vld [vmem:[%s1525_s2 + $0x8] sm:$0xff]  ;;  %v262_v2 = vld [vmem:[%s1525_s2 + $0x18] sm:$0xff]  ;;  %s245_s11 = scalar_select %p244_p11, %s1049_s21, 1  ;;  %v259_v4 = vld [vmem:[%s1525_s2] sm:$0xff]  ;;  %vm300_vm0 = vcmask 1043456  }
  0x15   : > { %961 = vset.pattern.permute.xlu1 %v1059_v0  ;;  %960 = vset.pattern.permute.xlu0 %v1059_v0  ;;  %v261_v5 = vld [vmem:[%s1525_s2 + $0x10] sm:$0xff]  ;;  %v254_v6 = vld [vmem:[%s1524_s1] sm:$0xff]  ;;  %vm287_vm1 = vcmask 31744   ;;  %v257_v7 = vld [vmem:[%s1524_s1 + $0x18] sm:$0xff]  ;;  %s773_s21 = scalar_lea.sflag [#allocation3], %s240_s17 }
  0x16   : > { %270 = vperm.xlu1 %961, %v260_v1   ;;  %280 = vperm.xlu0 %960, %v262_v2   ;;  %s900_s12 = sshll.u32 %s245_s11, 3  ;;  %v255_v10 = vld [vmem:[%s1524_s1 + $0x8] sm:$0xff]  ;;  %v256_v11 = vld [vmem:[%s1524_s1 + $0x10] sm:$0xff]  ;;  %s993_s11 = sshra.s32 %s791_s10, 4  ;;  %s994_s11 = int_to_ptr.hbm [resolvable:$true] %s993_s11 }
  0x17   : > { %962 = vset.pattern.permute.xlu2 %v1059_v0  ;;  %s251_s15 = scalar_lea.vmem %s1523_s0, %s900_s12  ;;  %s995_s12 = scalar_lea.hbm %s994_s11, 8 }
  0x18   : > { %v258_v3 = vld [vmem:[%s251_s15] sm:$0xff]  ;;  %p996_p12 = scmp.ne.s32.totalorder %s994_s11, %s995_s12  ;;  %s999_s15 = scalar_lea.hbm %s1528_s5, 16 }
  0x19   : > { %284 = vst [vmem:[#allocation1] ss:$2 sm:$0xff] %v258_v3  ;;  %p1000_p1 = scmp.lt.s32.totalorder %s994_s11, %s1528_s5  ;;  %p1001_p2 = scmp.lt.s32.totalorder %s999_s15, %s995_s12 }
  0x1a   : > { %p997_p13 = pnand %p996_p12, %p1130_p4 }
  0x1b   : > { %p1002_p3 = por %p1001_p2, %p1000_p1 }
  0x1c   : > { %p998_p0 = pneg %p997_p13 }
  0x1e   : > { %265 = vperm.xlu1 %961, %v259_v4   ;;  %275 = vperm.xlu0 %960, %v261_v5   ;;  %p1003_p5 = pnand %p1002_p3, %p998_p0 }
  0x20   : > { %v285_v8 = vld.sshfl [vmem:[#allocation1] sm:$0xff pattern:$0x75316420]  ;;  %v286_v9 = vld.sshfl [vmem:[#allocation1 + $0x8] sm:$0xff pattern:$0x75316420] }
  0x21   : > { %875 = vmatpush.msk.msra.mxu0 %vm300_vm0, %v285_v8  ;;  %902 = vmatpush.msk.msra.mxu2 %vm300_vm0, %v285_v8 }
  0x22   : > { %880 = vmatpush.msk.msra.mxu1 %vm300_vm0, %v286_v9  ;;  %903 = vmatpush.msk.msra.mxu3 %vm300_vm0, %v286_v9 }
  0x23   : > { %876 = vmatmul.msk.f32.vlgmr.msra.gmra.mxu0 %vm287_vm1, %v254_v6  ;;  %879 = vmatmul.msk.f32.vlgmr.msra.gmra.mxu2 %vm287_vm1, %v257_v7 }
  0x24   : > { %881 = vmatmul.msk.f32.vlgmr.msra.gmra.mxu1 %vm287_vm1, %v254_v6  ;;  %884 = vmatmul.msk.f32.vlgmr.msra.gmra.mxu3 %vm287_vm1, %v257_v7 }
  0x2b   : > { %877 = vmatmul.msk.f32.gmra.mxu0 %vm287_vm1, %v255_v10 }
  0x2c   : > { %882 = vmatmul.msk.f32.gmra.mxu1 %vm287_vm1, %v255_v10 }
  0x33   : > { %878 = vmatmul.msk.f32.gmra.mxu0 %vm287_vm1, %v256_v11 }
  0x34   : > { %883 = vmatmul.msk.f32.gmra.mxu1 %vm287_vm1, %v256_v11 }
  0x88   : > { %v271_v12 = vpop.permute.xlu1 %270  ;;  %v281_v18 = vpop.permute.xlu0 %280 }
  0x90   : > { %v266_v13 = vpop.permute.xlu1 %265  ;;  %v276_v46 = vpop.permute.xlu0 %275 }
  0xa0   : > { %v322_v14 = vpop.f32.mrf.mxu0 }
  0xa1   : > { %v1186_v15 = vadd.f32 %v322_v14, %v266_v13  ;;  %v351_v16 = vpop.f32.mrf.mxu1 }
  0xa2   : > { %v1191_v19 = vadd.f32 %v351_v16, %v266_v13 }
  0xa3   : > { %v1189_v17 = vmul.f32 0.70710677, %v1186_v15 }
  0xa4   : > { %v1205_v29 = vmul.f32 0.70710677, %v1191_v19 }
  0xa5   : > { %v379_v21 = vmul.f32 %v1189_v17, %v1189_v17 }
  0xa6   : > { %v331_v20 = vpop.f32.mrf.mxu2  ;;  %v419_v39 = vmul.f32 %v1205_v29, %v1205_v29 }
  0xa7   : > { %v1195_v22 = vadd.f32 %v331_v20, %v281_v18  ;;  %v360_v23 = vpop.f32.mrf.mxu3  ;;  %v1212_v32 = vmin.f32 %v379_v21, 16.0 }
  0xa8   : > { %v1197_v24 = vadd.f32 %v360_v23, %v281_v18  ;;  %v325_v25 = vpop.f32.mrf.mxu0  ;;  %v1242_v53 = vmin.f32 %v419_v39, 16.0 }
  0xa9   : > { %v1200_v26 = vmul.f32 0.70710677, %v1195_v22  ;;  %v1202_v27 = vadd.f32 %v325_v25, %v271_v12  ;;  %v354_v28 = vpop.f32.mrf.mxu1  ;;  %v381_v42 = vmul.f32 2.1237322e-06, %v1212_v32 }
  0xaa   : > { %v1208_v30 = vmul.f32 0.70710677, %v1197_v24  ;;  %v1210_v31 = vadd.f32 %v354_v28, %v271_v12  ;;  %v421_v1 = vmul.f32 2.1237322e-06, %v1242_v53 }
  0xab   : > { %v619_v33 = vmul.f32 %v1200_v26, %v1200_v26  ;;  %v1217_v34 = vmul.f32 0.70710677, %v1202_v27  ;;  %v382_v56 = vadd.f32 0.00028619796, %v381_v42 }
  0xac   : > { %v659_v35 = vmul.f32 %v1208_v30, %v1208_v30  ;;  %v1222_v36 = vmul.f32 0.70710677, %v1210_v31  ;;  %v422_v16 = vadd.f32 0.00028619796, %v421_v1 }
  0xad   : > { %v1224_v37 = vmin.f32 %v619_v33, 16.0  ;;  %v459_v38 = vmul.f32 %v1217_v34, %v1217_v34  ;;  %v383_v5 = vmul.f32 %v382_v56, %v1212_v32 }
  0xae   : > { %v1230_v40 = vmin.f32 %v659_v35, 16.0  ;;  %v499_v41 = vmul.f32 %v1222_v36, %v1222_v36  ;;  %v423_v42 = vmul.f32 %v422_v16, %v1242_v53 }
  0xaf   : > { %v621_v43 = vmul.f32 2.1237322e-06, %v1224_v37  ;;  %v1236_v44 = vmin.f32 %v459_v38, 16.0  ;;  %v384_v23 = vadd.f32 0.0036580483, %v383_v5 }
  0xb0   : > { %v661_v45 = vmul.f32 2.1237322e-06, %v1230_v40  ;;  %v1239_v47 = vmin.f32 %v499_v41, 16.0  ;;  %v328_v48 = vpop.f32.mrf.mxu0 }
  0xb1   : > { %v622_v49 = vadd.f32 0.00028619796, %v621_v43  ;;  %v461_v50 = vmul.f32 2.1237322e-06, %v1236_v44  ;;  %v329_v51 = vadd.f32 %v328_v48, %v276_v46  ;;  %v357_v52 = vpop.f32.mrf.mxu1  ;;  %v1276_v43 = vmul.f32 0.5, %v1195_v22 }
  0xb2   : > { %v662_v54 = vadd.f32 0.00028619796, %v661_v45  ;;  %v501_v55 = vmul.f32 2.1237322e-06, %v1239_v47  ;;  %v1246_v59 = vadd.f32 %v357_v52, %v276_v46  ;;  %v385_v48 = vmul.f32 %v384_v23, %v1212_v32 }
  0xb3   : > { %v623_v57 = vmul.f32 %v622_v49, %v1224_v37  ;;  %v462_v58 = vadd.f32 0.00028619796, %v461_v50  ;;  %v1249_v62 = vmul.f32 0.70710677, %v329_v51  ;;  %v1281_v49 = vmul.f32 0.5, %v1197_v24 }
  0xb4   : > { %v663_v60 = vmul.f32 %v662_v54, %v1230_v40  ;;  %v502_v61 = vadd.f32 0.00028619796, %v501_v55  ;;  %v1259_v8 = vmul.f32 0.70710677, %v1246_v59  ;;  %v632_v52 = vmul.f32 3.8918573e-05, %v1224_v37 }
  0xb5   : > { %v624_v63 = vadd.f32 0.0036580483, %v623_v57  ;;  %v463_v0 = vmul.f32 %v462_v58, %v1236_v44  ;;  %v539_v4 = vmul.f32 %v1249_v62, %v1249_v62  ;;  %v672_v57 = vmul.f32 3.8918573e-05, %v1230_v40 }
  0xb6   : > { %v664_v2 = vadd.f32 0.0036580483, %v663_v60  ;;  %v503_v3 = vmul.f32 %v502_v61, %v1239_v47  ;;  %v579_v14 = vmul.f32 %v1259_v8, %v1259_v8  ;;  %v633_v60 = vadd.f32 0.001143296, %v632_v52 }
  0xb7   : > { %v625_v6 = vmul.f32 %v624_v63, %v1224_v37  ;;  %v464_v7 = vadd.f32 0.0036580483, %v463_v0  ;;  %v1262_v11 = vmin.f32 %v539_v4, 16.0  ;;  %v1289_v61 = vmul.f32 3.8918573e-05, %v1212_v32 }
  0xb8   : > { %v665_v9 = vmul.f32 %v664_v2, %v1230_v40  ;;  %v504_v10 = vadd.f32 0.0036580483, %v503_v3  ;;  %v1270_v28 = vmin.f32 %v579_v14, 16.0  ;;  %v1291_v63 = vadd.f32 0.0036580483, %v423_v42 }
  0xb9   : > { %v626_v12 = vadd.f32 0.05243302, %v625_v6  ;;  %v465_v13 = vmul.f32 %v464_v7, %v1236_v44  ;;  %v541_v21 = vmul.f32 2.1237322e-06, %v1262_v11  ;;  %v673_v1 = vadd.f32 0.001143296, %v672_v57 }
  0xba   : > { %v666_v18 = vadd.f32 0.05243302, %v665_v9  ;;  %v505_v20 = vmul.f32 %v504_v10, %v1239_v47  ;;  %v581_v41 = vmul.f32 2.1237322e-06, %v1270_v28  ;;  %v1295_v2 = vadd.f32 0.05243302, %v385_v48 }
  0xbb   : > { %v627_v25 = vmul.f32 %v626_v12, %v1224_v37  ;;  %v466_v35 = vadd.f32 0.05243302, %v465_v13  ;;  %v542_v38 = vadd.f32 0.00028619796, %v541_v21  ;;  %v1297_v3 = vmul.f32 0.5, %v329_v51 }
  0xbc   : > { %v667_v33 = vmul.f32 %v666_v18, %v1230_v40  ;;  %v506_v39 = vadd.f32 0.05243302, %v505_v20  ;;  %v582_v50 = vadd.f32 0.00028619796, %v581_v41  ;;  %v634_v5 = vmul.f32 %v633_v60, %v1224_v37 }
  0xbd   : > { %v628_v45 = vadd.f32 0.18741608, %v627_v25  ;;  %v543_v46 = vmul.f32 %v542_v38, %v1262_v11  ;;  %v467_v55 = vmul.f32 %v466_v35, %v1236_v44  ;;  %v674_v10 = vmul.f32 %v673_v1, %v1230_v40 }
  0xbe   : > { %v668_v54 = vadd.f32 0.18741608, %v667_v33  ;;  %v507_v22 = vmul.f32 %v506_v39, %v1239_v47  ;;  %v583_v58 = vmul.f32 %v582_v50, %v1270_v28  ;;  %v635_v14 = vadd.f32 0.014752088, %v634_v5 }
  0xbf   : > { %v544_v56 = vadd.f32 0.0036580483, %v543_v46  ;;  %v629_v24 = vmul.f32 %v628_v45, %v1224_v37  ;;  %v468_v7 = vadd.f32 0.18741608, %v467_v55  ;;  %v552_v16 = vmul.f32 3.8918573e-05, %v1262_v11 }
  0xc0   : > { %v584_v4 = vadd.f32 0.0036580483, %v583_v58  ;;  %v669_v6 = vmul.f32 %v668_v54, %v1230_v40  ;;  %v508_v12 = vadd.f32 0.18741608, %v507_v22  ;;  %v675_v51 = vadd.f32 0.014752088, %v674_v10 }
  0xc1   : > { %v545_v0 = vmul.f32 %v544_v56, %v1262_v11  ;;  %v630_v18 = vadd.f32 1.1283791, %v629_v24  ;;  %v592_v21 = vmul.f32 3.8918573e-05, %v1270_v28  ;;  %v636_v25 = vmul.f32 %v635_v14, %v1224_v37 }
  0xc2   : > { %v585_v13 = vmul.f32 %v584_v4, %v1270_v28  ;;  %v553_v33 = vadd.f32 0.001143296, %v552_v16  ;;  %v472_v35 = vmul.f32 3.8918573e-05, %v1236_v44  ;;  %v676_v39 = vmul.f32 %v675_v51, %v1230_v40 }
  0xc3   : > { %v546_v9 = vadd.f32 0.05243302, %v545_v0  ;;  %v593_v41 = vadd.f32 0.001143296, %v592_v21  ;;  %v512_v42 = vmul.f32 3.8918573e-05, %v1239_v47  ;;  %v469_v52 = vmul.f32 %v468_v7, %v1236_v44 }
  0xc4   : > { %v586_v23 = vadd.f32 0.05243302, %v585_v13  ;;  %v637_v46 = vadd.f32 0.112945676, %v636_v25  ;;  %v554_v48 = vmul.f32 %v553_v33, %v1262_v11  ;;  %v473_v50 = vadd.f32 0.001143296, %v472_v35 }
  0xc5   : > { %v547_v20 = vmul.f32 %v546_v9, %v1262_v11  ;;  %v677_v54 = vadd.f32 0.112945676, %v676_v39  ;;  %v594_v55 = vmul.f32 %v593_v41, %v1270_v28  ;;  %v513_v56 = vadd.f32 0.001143296, %v512_v42 }
  0xc6   : > { %v587_v45 = vmul.f32 %v586_v23, %v1270_v28  ;;  %v638_v22 = vmul.f32 %v637_v46, %v1224_v37  ;;  %v555_v58 = vadd.f32 0.014752088, %v554_v48  ;;  %v474_v60 = vmul.f32 %v473_v50, %v1236_v44 }
  0xc7   : > { %v548_v38 = vadd.f32 0.18741608, %v547_v20  ;;  %v509_v24 = vmul.f32 %v508_v12, %v1239_v47  ;;  %v678_v0 = vmul.f32 %v677_v54, %v1230_v40  ;;  %v595_v1 = vadd.f32 0.014752088, %v594_v55 }
  0xc8   : > { %v588_v57 = vadd.f32 0.18741608, %v587_v45  ;;  %v514_v4 = vmul.f32 %v513_v56, %v1239_v47  ;;  %v639_v7 = vadd.f32 0.4994258, %v638_v22  ;;  %v556_v9 = vmul.f32 %v555_v58, %v1262_v11 }
  0xc9   : > { %v549_v5 = vmul.f32 %v548_v38, %v1262_v11  ;;  %v475_v10 = vadd.f32 0.014752088, %v474_v60  ;;  %v670_v13 = vadd.f32 1.1283791, %v669_v6  ;;  %v679_v14 = vadd.f32 0.4994258, %v678_v0 }
  0xca   : > { %v596_v16 = vmul.f32 %v595_v1, %v1270_v28  ;;  %v515_v20 = vadd.f32 0.014752088, %v514_v4  ;;  %v589_v51 = vmul.f32 %v588_v57, %v1270_v28  ;;  %v640_v12 = vmul.f32 %v639_v7, %v1224_v37 }
  0xcb   : > { %v557_v21 = vadd.f32 0.112945676, %v556_v9  ;;  %v476_v23 = vmul.f32 %v475_v10, %v1236_v44  ;;  %v470_v25 = vadd.f32 1.1283791, %v469_v52  ;;  %v680_v33 = vmul.f32 %v679_v14, %v1230_v40 }
  0xcc   : > { %v597_v35 = vadd.f32 0.112945676, %v596_v16  ;;  %v516_v38 = vmul.f32 %v515_v20, %v1239_v47  ;;  %v510_v39 = vadd.f32 1.1283791, %v509_v24  ;;  %v550_v41 = vadd.f32 1.1283791, %v549_v5 }
  0xcd   : > { %v1327_v6 = vadd.f32 1.0, %v640_v12  ;;  %v558_v42 = vmul.f32 %v557_v21, %v1262_v11  ;;  %v1330_v45 = vadd.f32 1.0, %v680_v33  ;;  %v477_v37 = vadd.f32 0.112945676, %v476_v23 }
  0xce   : > { %v598_v46 = vmul.f32 %v597_v35, %v1270_v28  ;;  %v517_v48 = vadd.f32 0.112945676, %v516_v38  ;;  %v1334_v50 = vmul.f32 %v630_v18, %v1200_v26  ;;  %v1337_v40 = vmul.f32 0.5, %v1246_v59 }
  0xcf   : > { %v590_v52 = vadd.f32 1.1283791, %v589_v51  ;;  %963 = vrcp.f32 %v1327_v6  ;;  %v1341_v54 = vmul.f32 %v670_v13, %v1208_v30  ;;  %v1344_v55 = vmul.f32 %v470_v25, %v1217_v34 }
  0xd0   : > { %965 = vrcp.f32 %v1330_v45  ;;  %v393_v56 = vadd.f32 0.001143296, %v1289_v61  ;;  %v1349_v57 = vmul.f32 %v510_v39, %v1222_v36  ;;  %v1352_v26 = vmul.f32 %v550_v41, %v1249_v62 }
  0xd1   : > { %v559_v59 = vadd.f32 0.4994258, %v558_v42  ;;  %v599_v18 = vadd.f32 0.4994258, %v598_v46  ;;  %v651_v22 = vand.u32 2147483647, %v1327_v6  ;;  %v478_v58 = vmul.f32 %v477_v37, %v1236_v44 }
  0xd2   : > { %v653_v30 = vand.u32 2147483648, %v1327_v6  ;;  %v518_v34 = vmul.f32 %v517_v48, %v1239_v47  ;;  %v1359_v60 = vmul.f32 %v590_v52, %v1259_v8  ;;  %v691_v61 = vand.u32 2147483647, %v1330_v45 }
  0xd3   : > { %v560_v36 = vmul.f32 %v559_v59, %v1262_v11  ;;  %v600_v62 = vmul.f32 %v599_v18, %v1270_v28  ;;  %vm647_vm2 = vweird.f32 %v1327_v6  ;;  %v479_v24 = vadd.f32 0.4994258, %v478_v58 }
  0xd4   : > { %v519_v0 = vadd.f32 0.4994258, %v518_v34  ;;  %v394_v1 = vmul.f32 %v393_v56, %v1212_v32  ;;  %vm687_vm3 = vweird.f32 %v1330_v45  ;;  %v693_v5 = vand.u32 2147483648, %v1330_v45 }
  0xd5   : > { %v964_v4 = vpop.eup %963  ;;  %v1368_v7 = vadd.f32 1.0, %v560_v36  ;;  %v1370_v8 = vadd.f32 1.0, %v600_v62  ;;  %vm1373_vm4 = vcmp.eq.f32.partialorder %v651_v22, 8.507059e+37  ;;  %v654_v10 = vor.u32 1.1754944e-38, %v653_v30 }
  0xd6   : > { %v966_v9 = vpop.eup %965  ;;  %v643_v11 = vmul.f32 %v964_v4, %v1327_v6  ;;  %v480_v13 = vmul.f32 %v479_v24, %v1236_v44  ;;  %vm1379_vm5 = vcmp.eq.f32.partialorder %v691_v61, 8.507059e+37  ;;  %v520_v20 = vmul.f32 %v519_v0, %v1239_v47 }
  0xd7   : > { %v683_v14 = vmul.f32 %v966_v9, %v1330_v45  ;;  %967 = vrcp.f32 %v1368_v7  ;;  %v395_v12 = vadd.f32 0.014752088, %v394_v1  ;;  %v432_v21 = vmul.f32 3.8918573e-05, %v1242_v53 }
  0xd8   : > { %v644_v51 = vsub.f32 1.0, %v643_v11  ;;  %969 = vrcp.f32 %v1370_v8  ;;  %vm648_vm6 = vweird.f32 %v964_v4  ;;  %v694_v25 = vor.u32 1.1754944e-38, %v693_v5 }
  0xd9   : > { %v684_v23 = vsub.f32 1.0, %v683_v14  ;;  %v571_v44 = vand.u32 2147483647, %v1368_v7  ;;  %v573_v35 = vand.u32 2147483648, %v1368_v7  ;;  %v613_v38 = vand.u32 2147483648, %v1370_v8  ;;  %vm649_vm8 = vmor %vm647_vm2, %vm648_vm6 }
  0xda   : > { %v645_v33 = vmul.f32 %v964_v4, %v644_v51  ;;  %v1390_v39 = vadd.f32 1.0, %v480_v13  ;;  %vm688_vm7 = vweird.f32 %v966_v9  ;;  %v611_v47 = vand.u32 2147483647, %v1370_v8 }
  0xdb   : > { %v685_v41 = vmul.f32 %v966_v9, %v684_v23  ;;  %v1393_v42 = vadd.f32 1.0, %v520_v20  ;;  %v396_v37 = vmul.f32 %v395_v12, %v1212_v32  ;;  %v433_v48 = vadd.f32 0.001143296, %v432_v21  ;;  %vm689_vm11 = vmor %vm687_vm3, %vm688_vm7 }
  0xdc   : > { %v646_v46 = vadd.f32 %v964_v4, %v645_v33  ;;  %971 = vrcp.f32 %v1390_v39  ;;  %vm567_vm9 = vweird.f32 %v1368_v7  ;;  %vm607_vm10 = vweird.f32 %v1370_v8 }
  0xdd   : > { %v968_v52 = vpop.eup %967  ;;  %v686_v56 = vadd.f32 %v966_v9, %v685_v41  ;;  %973 = vrcp.f32 %v1393_v42  ;;  %vm1407_vm12 = vcmp.eq.f32.partialorder %v571_v44, 8.507059e+37  ;;  %v574_v6 = vor.u32 1.1754944e-38, %v573_v35 }
  0xde   : > { %v970_v59 = vpop.eup %969  ;;  %v650_v18 = vsel %vm649_vm8, %v964_v4, %v646_v46  ;;  %v563_v22 = vmul.f32 %v968_v52, %v1368_v7  ;;  %v614_v58 = vor.u32 1.1754944e-38, %v613_v38  ;;  %vm1414_vm13 = vcmp.eq.f32.partialorder %v611_v47, 8.507059e+37 }
  0xdf   : > { %v655_v34 = vsel %vm1373_vm4, %v654_v10, %v650_v18  ;;  %v690_v61 = vsel %vm689_vm11, %v966_v9, %v686_v56  ;;  %v603_v36 = vmul.f32 %v970_v59, %v1370_v8  ;;  %v491_v45 = vand.u32 2147483647, %v1390_v39 }
  0xe0   : > { %v656_v24 = vmul.f32 %v655_v34, %v1334_v50  ;;  %v695_v0 = vsel %vm1379_vm5, %v694_v25, %v690_v61  ;;  %v564_v1 = vsub.f32 1.0, %v563_v22  ;;  %v493_v4 = vand.u32 2147483648, %v1390_v39 }
  0xe1   : > { %v696_v5 = vmul.f32 %v695_v0, %v1341_v54  ;;  %vm568_vm14 = vweird.f32 %v968_v52  ;;  %v604_v9 = vsub.f32 1.0, %v603_v36  ;;  %vm608_vm15 = vweird.f32 %v970_v59 }
  0xe2   : > { %vm487_vm1 = vweird.f32 %v1390_v39  ;;  %v972_v11 = vpop.eup %971  ;;  %v891_v28 = vclamps-f32 %v656_v24, 1.0  ;;  %v565_v10 = vmul.f32 %v968_v52, %v564_v1  ;;  %vm527_vm2 = vweird.f32 %v1393_v42  ;;  %vm569_vm4 = vmor %vm567_vm9, %vm568_vm14 }
  0xe3   : > { %v531_v50 = vand.u32 2147483647, %v1393_v42  ;;  %v533_v13 = vand.u32 2147483648, %v1393_v42  ;;  %v974_v14 = vpop.eup %973  ;;  %v892_v16 = vclamps-f32 %v696_v5, 1.0  ;;  %v605_v20 = vmul.f32 %v970_v59, %v604_v9  ;;  %vm609_vm6 = vmor %vm607_vm10, %vm608_vm15 }
  0xe4   : > { %v483_v51 = vmul.f32 %v972_v11, %v1390_v39  ;;  %vm1429_vm3 = vcmp.eq.f32.partialorder %v491_v45, 8.507059e+37  ;;  %v397_v12 = vadd.f32 0.112945676, %v396_v37  ;;  %v705_v21 = vadd.f32 1.0, %v891_v28 }
  0xe5   : > { %v566_v23 = vadd.f32 %v968_v52, %v565_v10  ;;  %v523_v25 = vmul.f32 %v974_v14, %v1393_v42  ;;  %v434_v44 = vmul.f32 %v433_v48, %v1242_v53  ;;  %v706_v33 = vadd.f32 1.0, %v892_v16 }
  0xe6   : > { %v606_v35 = vadd.f32 %v970_v59, %v605_v20  ;;  %v484_v38 = vsub.f32 1.0, %v483_v51  ;;  %vm488_vm5 = vweird.f32 %v972_v11  ;;  %v713_v41 = vmul.f32 %v705_v21, %v1276_v43 }
  0xe7   : > { %v570_v47 = vsel %vm569_vm4, %v968_v52, %v566_v23  ;;  %v524_v46 = vsub.f32 1.0, %v523_v25  ;;  %vm528_vm7 = vweird.f32 %v974_v14  ;;  %v714_v37 = vmul.f32 %v706_v33, %v1281_v49  ;;  %vm489_vm8 = vmor %vm487_vm1, %vm488_vm5 }
  0xe8   : > { %v575_v48 = vsel %vm1407_vm12, %v574_v6, %v570_v47  ;;  %v610_v56 = vsel %vm609_vm6, %v970_v59, %v606_v35  ;;  %v485_v7 = vmul.f32 %v972_v11, %v484_v38  ;;  %738 = vmatpush.msrb.mxu2 %v713_v41  ;;  %v398_v22 = vmul.f32 %v397_v12, %v1212_v32  ;;  %vm529_vm10 = vmor %vm527_vm2, %vm528_vm7 }
  0xe9   : > { %v576_v18 = vmul.f32 %v575_v48, %v1352_v26  ;;  %v615_v43 = vsel %vm1414_vm13, %v614_v58, %v610_v56  ;;  %v525_v52 = vmul.f32 %v974_v14, %v524_v46  ;;  %758 = vmatpush.msrb.mxu3 %v714_v37  ;;  %v494_v61 = vor.u32 1.1754944e-38, %v493_v4 }
  0xea   : > { %v616_v8 = vmul.f32 %v615_v43, %v1359_v60  ;;  %v486_v34 = vadd.f32 %v972_v11, %v485_v7  ;;  %v435_v49 = vadd.f32 0.014752088, %v434_v44  ;;  %vm532_vm9 = vcmp.eq.f32.partialorder %v531_v50, 8.507059e+37 }
  0xeb   : > { %v889_v36 = vclamps-f32 %v576_v18, 1.0  ;;  %v526_v59 = vadd.f32 %v974_v14, %v525_v52  ;;  %v399_v26 = vadd.f32 0.4994258, %v398_v22  ;;  %v534_v58 = vor.u32 1.1754944e-38, %v533_v13 }
  0xec   : > { %v890_v30 = vclamps-f32 %v616_v8, 1.0  ;;  %v490_v6 = vsel %vm489_vm8, %v972_v11, %v486_v34  ;;  %v436_v60 = vmul.f32 %v435_v49, %v1242_v53  ;;  %v425_v9 = vmul.f32 %v1291_v63, %v1242_v53 }
  0xed   : > { %v703_v62 = vadd.f32 1.0, %v889_v36  ;;  %v495_v45 = vsel %vm1429_vm3, %v494_v61, %v490_v6  ;;  %v530_v24 = vsel %vm529_vm10, %v974_v14, %v526_v59  ;;  %v400_v39 = vmul.f32 %v399_v26, %v1212_v32 }
  0xee   : > { %v704_v0 = vadd.f32 1.0, %v890_v30  ;;  %v496_v1 = vmul.f32 %v495_v45, %v1344_v55  ;;  %v535_v4 = vsel %vm532_vm9, %v534_v58, %v530_v24  ;;  %v437_v5 = vadd.f32 0.112945676, %v436_v60  ;;  %v715_v45 = vld [vmem:[%s1526_s3] sm:$0xf] }
  0xef   : > { %v711_v42 = vmul.f32 %v703_v62, %v1297_v3  ;;  %v536_v11 = vmul.f32 %v535_v4, %v1349_v57  ;;  %v401_v28 = vadd.f32 1.0, %v400_v39  ;;  %v387_v10 = vmul.f32 %v1295_v2, %v1212_v32  ;;  %v716_v2 = vld [vmem:[%s1527_s4] sm:$0xf] }
  0xf0   : > { %v712_v50 = vmul.f32 %v704_v0, %v1337_v40  ;;  %v887_v13 = vclamps-f32 %v496_v1, 1.0  ;;  %v438_v14 = vmul.f32 %v437_v5, %v1242_v53  ;;  %v365_v16 = vmul.f32 0.5, %v1202_v27  ;;  %719 = vperm.xlu2 %962, %v716_v2  }
  0xf1   : > { %739 = vmatpush.msrb.mxu2 %v711_v42  ;;  %v888_v55 = vclamps-f32 %v536_v11, 1.0  ;;  %975 = vrcp.f32 %v401_v28  ;;  %v426_v3 = vadd.f32 0.05243302, %v425_v9  ;;  %v366_v57 = vmul.f32 0.5, %v1210_v31 }
  0xf2   : > { %759 = vmatpush.msrb.mxu3 %v712_v50  ;;  %v701_v63 = vadd.f32 1.0, %v887_v13  ;;  %v439_v20 = vadd.f32 0.4994258, %v438_v14  ;;  %v388_v40 = vadd.f32 0.18741608, %v387_v10  ;;  %v413_v38 = vand.u32 2147483648, %v401_v28 }
  0xf3   : > { %v702_v51 = vadd.f32 1.0, %v888_v55  ;;  %v427_v25 = vmul.f32 %v426_v3, %v1242_v53  ;;  %v411_v46 = vand.u32 2147483647, %v401_v28  ;;  %vm407_vm12 = vweird.f32 %v401_v28 }
  0xf4   : > { %v709_v54 = vmul.f32 %v701_v63, %v365_v16  ;;  %v440_v12 = vmul.f32 %v439_v20, %v1242_v53  ;;  %v389_v44 = vmul.f32 %v388_v40, %v1212_v32  ;;  %v414_v7 = vor.u32 1.1754944e-38, %v413_v38 }
  0xf5   : > { %v710_v21 = vmul.f32 %v702_v51, %v366_v57  ;;  %v428_v35 = vadd.f32 0.18741608, %v427_v25  ;;  %vm412_vm14 = vcmp.eq.f32.partialorder %v411_v46, 8.507059e+37  ;;  %vm722_vm4 = vcmask 261120  }
  0xf6   : > { %740 = vmatpush.msrb.mxu2 %v709_v54  ;;  %v441_v23 = vadd.f32 1.0, %v440_v12  ;;  %v390_v41 = vadd.f32 1.1283791, %v389_v44 }
  0xf7   : > { %v976_v27 = vpop.eup %975  ;;  %760 = vmatpush.msrb.mxu3 %v710_v21  ;;  %v429_v56 = vmul.f32 %v428_v35, %v1242_v53  ;;  %v363_v53 = vmul.f32 0.5, %v1186_v15  ;;  %v364_v15 = vmul.f32 0.5, %v1191_v19 }
  0xf8   : > { %v403_v31 = vmul.f32 %v976_v27, %v401_v28  ;;  %977 = vrcp.f32 %v441_v23  ;;  %vm408_vm11 = vweird.f32 %v976_v27  ;;  %v391_v43 = vmul.f32 %v390_v41, %v1189_v17 }
  0xf9   : > { %vm409_vm13 = vmor %vm407_vm12, %vm408_vm11  ;;  %v453_v34 = vand.u32 2147483648, %v441_v23  ;;  %v430_v61 = vadd.f32 1.1283791, %v429_v56  ;;  %v451_v36 = vand.u32 2147483647, %v441_v23  ;;  %vm447_vm1 = vweird.f32 %v441_v23 }
  0xfa   : > { %v404_v33 = vsub.f32 1.0, %v403_v31 }
  0xfb   : > { %v454_v6 = vor.u32 1.1754944e-38, %v453_v34  ;;  %v431_v17 = vmul.f32 %v430_v61, %v1205_v29  ;;  %vm452_vm3 = vcmp.eq.f32.partialorder %v451_v36, 8.507059e+37 }
  0xfc   : > { %v405_v47 = vmul.f32 %v976_v27, %v404_v33 }
  0xfe   : > { %v978_v37 = vpop.eup %977  ;;  %v406_v48 = vadd.f32 %v976_v27, %v405_v47 }
  0xff   : > { %v443_v18 = vmul.f32 %v978_v37, %v441_v23  ;;  %vm448_vm15 = vweird.f32 %v978_v37 }
 0x100   : > { %v410_v32 = vsel %vm409_vm13, %v976_v27, %v406_v48  ;;  %vm449_vm2 = vmor %vm447_vm1, %vm448_vm15 }
 0x101   : > { %v415_v52 = vsel %vm412_vm14, %v414_v7, %v410_v32  ;;  %v444_v22 = vsub.f32 1.0, %v443_v18 }
 0x102   : > { %v416_v8 = vmul.f32 %v415_v52, %v391_v43 }
 0x103   : > { %v445_v49 = vmul.f32 %v978_v37, %v444_v22 }
 0x104   : > { %v885_v59 = vclamps-f32 %v416_v8, 1.0 }
 0x105   : > { %v446_v26 = vadd.f32 %v978_v37, %v445_v49 }
 0x106   : > { %v699_v30 = vadd.f32 1.0, %v885_v59 }
 0x107   : > { %v450_v58 = vsel %vm449_vm2, %v978_v37, %v446_v26 }
 0x108   : > { %v707_v60 = vmul.f32 %v699_v30, %v363_v53  ;;  %v455_v62 = vsel %vm452_vm3, %v454_v6, %v450_v58 }
 0x109   : > { %v456_v24 = vmul.f32 %v455_v62, %v431_v17 }
 0x10a   : > { %741 = vmatpush.msrb.mxu2 %v707_v60 }
 0x10b   : > { %v886_v39 = vclamps-f32 %v456_v24, 1.0  ;;  %893 = vmatmul.msk.f32.vlgmr.msrb.gmra.mxu2 %vm722_vm4, %v715_v45 }
 0x10d   : > { %v700_v0 = vadd.f32 1.0, %v886_v39 }
 0x10f   : > { %v708_v1 = vmul.f32 %v700_v0, %v364_v15 }
 0x111   : > { %761 = vmatpush.msrb.mxu3 %v708_v1 }
 0x112   : > { %894 = vmatmul.msk.f32.vlgmr.msrb.gmra.mxu3 %vm722_vm4, %v715_v45 }
 0x14a   : > { %v720_v29 = vpop.permute.xlu2 %719 }
 0x18e   : > { %v743_v5 = vpop.f32.mrf.mxu2 }
 0x18f   : > { %v744_v42 = vadd.f32 %v743_v5, %v720_v29 }
 0x195   : > { %v763_v4 = vpop.f32.mrf.mxu3 }
 0x196   : > { %v764_v9 = vadd.f32 %v763_v4, %v720_v29 }
 0x198   : > { %v768_v19 = vrot.slane %v764_v9, 4 }
 0x19a   : > { %v769_v11 = vsel %vm300_vm0, %v744_v42, %v768_v19 }
 0x19b   : > { %771 = vst [vmem:[%s242_s8] sm:$0xff] %v769_v11 }
 0x19c   : > { %1006 = shalt.err (!%p1003_p5)
}
 0x19d   : > { %904 = dma.vmem_to_hbm [thread:$0]  (%p1130_p4), %s789_s9, 128, %s791_s10, %s773_s21  }
 0x19e PF: > { %p910_p6 = scmp.ge.s32.totalorder %s1057_s23, 2  ;;  %s802_s17 = sand.u32 1, %s1037_s18  }
 0x19f   : > { %s803_s25 = scalar_lea.sflag [#allocation3], %s802_s17 }
 0x1a0   : > { %p907_p7 = pnand %p910_p6, %p1137_p8 }
 0x1a2   : > { %p908_p9 = pneg %p907_p7 }
 0x1a4   : > { %1032 = dma.done.wait (%p908_p9), %s803_s25, 128  }
 0x1a5   : > { %1034 = vsyncadd (%p908_p9), %s803_s25, 4294967168  ;;  %s18_s23 = sadd.s32 1, %s1057_s23   ;;  %s1541_s18 = smov %s1041_s19 }
 0x1a6   : > { %p15_p10 = scmp.ge.s32.totalorder %s18_s23, 4   ;;  %s1542_s19 = smov %s1045_s20 }
 0x1a7   : > { %s1543_s20 = smov %s1143_s6  ;;  %s1544_s21 = smov %s1053_s22 }
 0x1a8   : > { %s1545_s22 = smov %s1547_s26  ;;  %17 = sbr.rel (!%p15_p10) target bundleno = 4 (0x4), region = 75 }
 0x1ad   :  { %809 = vsyncpa [#allocation3], 1 }
 0x1ae   :  { %811 = vsyncpa [#allocation3 + $0x1], 1 }

// kernel: tpu_custom_call.1
= control target key start
LH: loop header
LB: loop body
LE: loop exit
PB: predicated region body
PF: predicated region fallthrough
CT: control target
= control target key end

     0   :  { %10 = vsyncpa [#allocation3], 0  ;;  %s1523_s0 = inlined_call_operand.vmem [shape: f32[2,4,256], index: 0, kind: input, shape index: {}]   ;;  %s1524_s1 = inlined_call_operand.vmem [shape: f32[32,4], index: 1, kind: input, shape index: {}]   ;;  %s1525_s2 = inlined_call_operand.vmem [shape: f32[32,1], index: 2, kind: input, shape index: {}]   ;;  %s1526_s3 = inlined_call_operand.vmem [shape: f32[4,32], index: 3, kind: input, shape index: {}]   ;;  %s1527_s4 = inlined_call_operand.vmem [shape: f32[4,1], index: 4, kind: input, shape index: {}]   ;;  %s1528_s5 = inlined_call_operand.hbm [shape: f32[2,4,256], index: 5, kind: output, shape index: {}]  }
   0x1   :  { %12 = vsyncpa [#allocation3 + $0x1], 0  ;;  %s1090_s18 = smov 0   ;;  %s1092_s19 = smov 0  }
   0x2   :  { %s1094_s20 = smov 0   ;;  %s1096_s21 = smov 0  }
   0x3   :  { %s1098_s22 = smov 0   ;;  %s1100_s23 = smov 0  }
   0x4 LB: > { %s867_s24 = sadd.s32 4294967295, %s1057_s23   ;;  %s868_s25 = sadd.s32 4294967294, %s1057_s23   ;;  %s1057_s23 = sphi %s1100_s23, %s18_s23   ;;  %s1053_s22 = sphi %s1098_s22, %s1545_s22   ;;  %s1049_s21 = sphi %s1096_s21, %s1544_s21   ;;  %s1045_s20 = sphi %s1094_s20, %s1543_s20   ;;  %s1041_s19 = sphi %s1092_s19, %s1542_s19   ;;  %s1037_s18 = sphi %s1090_s18, %s1541_s18  }
   0x5   : > { %s30_s26 = sadd.s32 1, %s1053_s22  ;;  %s151_s27 = sadd.s32 1, %s1045_s20 }
   0x6   : > { %p32_p0 = scmp.ge.s32.totalorder %s30_s26, 2  ;;  %p161_p1 = scmp.ne.s32.totalorder %s1045_s20, %s1041_s19 }
   0x7   : > { %p162_p2 = scmp.eq.s32.totalorder %s867_s24, 1  ;;  %p167_p3 = scmp.ne.s32.totalorder %s1041_s19, %s1037_s18 }
   0x8   : > { %s1547_s26 = smov (%p32_p0, %s30_s26), 0  ;;  %p168_p5 = scmp.eq.s32.totalorder %s868_s25, 1 }
   0x9   : > { %p1130_p4 = por %p162_p2, %p161_p1  ;;  %s146_s29 = ssub.s32 %s1053_s22, %s1547_s26 }
   0xa   : > { %p871_p6 = scmp.ge.s32.totalorder %s1057_s23, 1  ;;  %p149_p7 = scmp.eq.s32.totalorder %s146_s29, 0 }
   0xb   : > { %p1137_p8 = por %p168_p5, %p167_p3  ;;  %p211_p9 = scmp.lt.s32.totalorder %s1057_s23, 3 }
   0xc   : > { %s1143_s6 = scalar_select %p149_p7, %s1045_s20, %s151_s27  }
   0xd   : > { %p212_p10 = pnand %p871_p6, %p211_p9 }
   0xe   : > { %p244_p11 = scmp.lt.s32.totalorder (!%p212_p10), %s1049_s21, 1  ;;  %s240_s17 = sand.u32 (!%p212_p10), 1, %s1041_s19  }
   0xf   : > { %215 = sbr.rel (%p212_p10) target bundleno = 414 (0x19e), region = 40  ;;  %s872_s24 = sshll.u32 (!%p212_p10), %s240_s17, 3 }
  0x10   : > { %s901_s25 = sshll.u32 (!%p212_p10), %s1049_s21, 3  ;;  %s242_s8 = scalar_lea.vmem (!%p212_p10), [#allocation2], %s872_s24 }
  0x11   : > { %s786_s7 = scalar_lea.hbm (!%p212_p10), %s1528_s5, %s901_s25  ;;  %s788_s9 = sshll.u32 (!%p212_p10), %s242_s8, 4  ;;  %s789_s9 = int_to_ptr.vmem [resolvable:$true] %s788_s9 }
  0x12   : > { %s790_s10 = sshll.u32 (!%p212_p10), %s786_s7, 4  ;;  %s791_s10 = int_to_ptr.hbm [resolvable:$true] %s790_s10 }
  0x14   : > { %v1059_v0 = vmov 0   ;;  %v260_v1 = vld [vmem:[%s1525_s2 + $0x8] sm:$0xff]  ;;  %v262_v2 = vld [vmem:[%s1525_s2 + $0x18] sm:$0xff]  ;;  %s245_s11 = scalar_select %p244_p11, %s1049_s21, 1  ;;  %v259_v4 = vld [vmem:[%s1525_s2] sm:$0xff]  ;;  %vm300_vm0 = vcmask 1043456  }
  0x15   : > { %961 = vset.pattern.permute.xlu1 %v1059_v0  ;;  %960 = vset.pattern.permute.xlu0 %v1059_v0  ;;  %v261_v5 = vld [vmem:[%s1525_s2 + $0x10] sm:$0xff]  ;;  %v254_v6 = vld [vmem:[%s1524_s1] sm:$0xff]  ;;  %vm287_vm1 = vcmask 31744   ;;  %v257_v7 = vld [vmem:[%s1524_s1 + $0x18] sm:$0xff]  ;;  %s773_s21 = scalar_lea.sflag [#allocation3], %s240_s17 }
  0x16   : > { %270 = vperm.xlu1 %961, %v260_v1   ;;  %280 = vperm.xlu0 %960, %v262_v2   ;;  %s900_s12 = sshll.u32 %s245_s11, 3  ;;  %v255_v10 = vld [vmem:[%s1524_s1 + $0x8] sm:$0xff]  ;;  %v256_v11 = vld [vmem:[%s1524_s1 + $0x10] sm:$0xff]  ;;  %s993_s11 = sshra.s32 %s791_s10, 4  ;;  %s994_s11 = int_to_ptr.hbm [resolvable:$true] %s993_s11 }
  0x17   : > { %962 = vset.pattern.permute.xlu2 %v1059_v0  ;;  %s251_s15 = scalar_lea.vmem %s1523_s0, %s900_s12  ;;  %s995_s12 = scalar_lea.hbm %s994_s11, 8 }
  0x18   : > { %v258_v3 = vld [vmem:[%s251_s15] sm:$0xff]  ;;  %p996_p12 = scmp.ne.s32.totalorder %s994_s11, %s995_s12  ;;  %s999_s15 = scalar_lea.hbm %s1528_s5, 16 }
  0x19   : > { %284 = vst [vmem:[#allocation1] ss:$2 sm:$0xff] %v258_v3  ;;  %p1000_p1 = scmp.lt.s32.totalorder %s994_s11, %s1528_s5  ;;  %p1001_p2 = scmp.lt.s32.totalorder %s999_s15, %s995_s12 }
  0x1a   : > { %p997_p13 = pnand %p996_p12, %p1130_p4 }
  0x1b   : > { %p1002_p3 = por %p1001_p2, %p1000_p1 }
  0x1c   : > { %p998_p0 = pneg %p997_p13 }
  0x1e   : > { %265 = vperm.xlu1 %961, %v259_v4   ;;  %275 = vperm.xlu0 %960, %v261_v5   ;;  %p1003_p5 = pnand %p1002_p3, %p998_p0 }
  0x20   : > { %v285_v8 = vld.sshfl [vmem:[#allocation1] sm:$0xff pattern:$0x75316420]  ;;  %v286_v9 = vld.sshfl [vmem:[#allocation1 + $0x8] sm:$0xff pattern:$0x75316420] }
  0x21   : > { %875 = vmatpush.msk.msra.mxu0 %vm300_vm0, %v285_v8  ;;  %902 = vmatpush.msk.msra.mxu2 %vm300_vm0, %v285_v8 }
  0x22   : > { %880 = vmatpush.msk.msra.mxu1 %vm300_vm0, %v286_v9  ;;  %903 = vmatpush.msk.msra.mxu3 %vm300_vm0, %v286_v9 }
  0x23   : > { %876 = vmatmul.msk.f32.vlgmr.msra.gmra.mxu0 %vm287_vm1, %v254_v6  ;;  %879 = vmatmul.msk.f32.vlgmr.msra.gmra.mxu2 %vm287_vm1, %v257_v7 }
  0x24   : > { %881 = vmatmul.msk.f32.vlgmr.msra.gmra.mxu1 %vm287_vm1, %v254_v6  ;;  %884 = vmatmul.msk.f32.vlgmr.msra.gmra.mxu3 %vm287_vm1, %v257_v7 }
  0x2b   : > { %877 = vmatmul.msk.f32.gmra.mxu0 %vm287_vm1, %v255_v10 }
  0x2c   : > { %882 = vmatmul.msk.f32.gmra.mxu1 %vm287_vm1, %v255_v10 }
  0x33   : > { %878 = vmatmul.msk.f32.gmra.mxu0 %vm287_vm1, %v256_v11 }
  0x34   : > { %883 = vmatmul.msk.f32.gmra.mxu1 %vm287_vm1, %v256_v11 }
  0x88   : > { %v271_v12 = vpop.permute.xlu1 %270  ;;  %v281_v18 = vpop.permute.xlu0 %280 }
  0x90   : > { %v266_v13 = vpop.permute.xlu1 %265  ;;  %v276_v46 = vpop.permute.xlu0 %275 }
  0xa0   : > { %v322_v14 = vpop.f32.mrf.mxu0 }
  0xa1   : > { %v1186_v15 = vadd.f32 %v322_v14, %v266_v13  ;;  %v351_v16 = vpop.f32.mrf.mxu1 }
  0xa2   : > { %v1191_v19 = vadd.f32 %v351_v16, %v266_v13 }
  0xa3   : > { %v1189_v17 = vmul.f32 0.70710677, %v1186_v15 }
  0xa4   : > { %v1205_v29 = vmul.f32 0.70710677, %v1191_v19 }
  0xa5   : > { %v379_v21 = vmul.f32 %v1189_v17, %v1189_v17 }
  0xa6   : > { %v331_v20 = vpop.f32.mrf.mxu2  ;;  %v419_v39 = vmul.f32 %v1205_v29, %v1205_v29 }
  0xa7   : > { %v1195_v22 = vadd.f32 %v331_v20, %v281_v18  ;;  %v360_v23 = vpop.f32.mrf.mxu3  ;;  %v1212_v32 = vmin.f32 %v379_v21, 16.0 }
  0xa8   : > { %v1197_v24 = vadd.f32 %v360_v23, %v281_v18  ;;  %v325_v25 = vpop.f32.mrf.mxu0  ;;  %v1242_v53 = vmin.f32 %v419_v39, 16.0 }
  0xa9   : > { %v1200_v26 = vmul.f32 0.70710677, %v1195_v22  ;;  %v1202_v27 = vadd.f32 %v325_v25, %v271_v12  ;;  %v354_v28 = vpop.f32.mrf.mxu1  ;;  %v381_v42 = vmul.f32 2.1237322e-06, %v1212_v32 }
  0xaa   : > { %v1208_v30 = vmul.f32 0.70710677, %v1197_v24  ;;  %v1210_v31 = vadd.f32 %v354_v28, %v271_v12  ;;  %v421_v1 = vmul.f32 2.1237322e-06, %v1242_v53 }
  0xab   : > { %v619_v33 = vmul.f32 %v1200_v26, %v1200_v26  ;;  %v1217_v34 = vmul.f32 0.70710677, %v1202_v27  ;;  %v382_v56 = vadd.f32 0.00028619796, %v381_v42 }
  0xac   : > { %v659_v35 = vmul.f32 %v1208_v30, %v1208_v30  ;;  %v1222_v36 = vmul.f32 0.70710677, %v1210_v31  ;;  %v422_v16 = vadd.f32 0.00028619796, %v421_v1 }
  0xad   : > { %v1224_v37 = vmin.f32 %v619_v33, 16.0  ;;  %v459_v38 = vmul.f32 %v1217_v34, %v1217_v34  ;;  %v383_v5 = vmul.f32 %v382_v56, %v1212_v32 }
  0xae   : > { %v1230_v40 = vmin.f32 %v659_v35, 16.0  ;;  %v499_v41 = vmul.f32 %v1222_v36, %v1222_v36  ;;  %v423_v42 = vmul.f32 %v422_v16, %v1242_v53 }
  0xaf   : > { %v621_v43 = vmul.f32 2.1237322e-06, %v1224_v37  ;;  %v1236_v44 = vmin.f32 %v459_v38, 16.0  ;;  %v384_v23 = vadd.f32 0.0036580483, %v383_v5 }
  0xb0   : > { %v661_v45 = vmul.f32 2.1237322e-06, %v1230_v40  ;;  %v1239_v47 = vmin.f32 %v499_v41, 16.0  ;;  %v328_v48 = vpop.f32.mrf.mxu0 }
  0xb1   : > { %v622_v49 = vadd.f32 0.00028619796, %v621_v43  ;;  %v461_v50 = vmul.f32 2.1237322e-06, %v1236_v44  ;;  %v329_v51 = vadd.f32 %v328_v48, %v276_v46  ;;  %v357_v52 = vpop.f32.mrf.mxu1  ;;  %v1276_v43 = vmul.f32 0.5, %v1195_v22 }
  0xb2   : > { %v662_v54 = vadd.f32 0.00028619796, %v661_v45  ;;  %v501_v55 = vmul.f32 2.1237322e-06, %v1239_v47  ;;  %v1246_v59 = vadd.f32 %v357_v52, %v276_v46  ;;  %v385_v48 = vmul.f32 %v384_v23, %v1212_v32 }
  0xb3   : > { %v623_v57 = vmul.f32 %v622_v49, %v1224_v37  ;;  %v462_v58 = vadd.f32 0.00028619796, %v461_v50  ;;  %v1249_v62 = vmul.f32 0.70710677, %v329_v51  ;;  %v1281_v49 = vmul.f32 0.5, %v1197_v24 }
  0xb4   : > { %v663_v60 = vmul.f32 %v662_v54, %v1230_v40  ;;  %v502_v61 = vadd.f32 0.00028619796, %v501_v55  ;;  %v1259_v8 = vmul.f32 0.70710677, %v1246_v59  ;;  %v632_v52 = vmul.f32 3.8918573e-05, %v1224_v37 }
  0xb5   : > { %v624_v63 = vadd.f32 0.0036580483, %v623_v57  ;;  %v463_v0 = vmul.f32 %v462_v58, %v1236_v44  ;;  %v539_v4 = vmul.f32 %v1249_v62, %v1249_v62  ;;  %v672_v57 = vmul.f32 3.8918573e-05, %v1230_v40 }
  0xb6   : > { %v664_v2 = vadd.f32 0.0036580483, %v663_v60  ;;  %v503_v3 = vmul.f32 %v502_v61, %v1239_v47  ;;  %v579_v14 = vmul.f32 %v1259_v8, %v1259_v8  ;;  %v633_v60 = vadd.f32 0.001143296, %v632_v52 }
  0xb7   : > { %v625_v6 = vmul.f32 %v624_v63, %v1224_v37  ;;  %v464_v7 = vadd.f32 0.0036580483, %v463_v0  ;;  %v1262_v11 = vmin.f32 %v539_v4, 16.0  ;;  %v1289_v61 = vmul.f32 3.8918573e-05, %v1212_v32 }
  0xb8   : > { %v665_v9 = vmul.f32 %v664_v2, %v1230_v40  ;;  %v504_v10 = vadd.f32 0.0036580483, %v503_v3  ;;  %v1270_v28 = vmin.f32 %v579_v14, 16.0  ;;  %v1291_v63 = vadd.f32 0.0036580483, %v423_v42 }
  0xb9   : > { %v626_v12 = vadd.f32 0.05243302, %v625_v6  ;;  %v465_v13 = vmul.f32 %v464_v7, %v1236_v44  ;;  %v541_v21 = vmul.f32 2.1237322e-06, %v1262_v11  ;;  %v673_v1 = vadd.f32 0.001143296, %v672_v57 }
  0xba   : > { %v666_v18 = vadd.f32 0.05243302, %v665_v9  ;;  %v505_v20 = vmul.f32 %v504_v10, %v1239_v47  ;;  %v581_v41 = vmul.f32 2.1237322e-06, %v1270_v28  ;;  %v1295_v2 = vadd.f32 0.05243302, %v385_v48 }
  0xbb   : > { %v627_v25 = vmul.f32 %v626_v12, %v1224_v37  ;;  %v466_v35 = vadd.f32 0.05243302, %v465_v13  ;;  %v542_v38 = vadd.f32 0.00028619796, %v541_v21  ;;  %v1297_v3 = vmul.f32 0.5, %v329_v51 }
  0xbc   : > { %v667_v33 = vmul.f32 %v666_v18, %v1230_v40  ;;  %v506_v39 = vadd.f32 0.05243302, %v505_v20  ;;  %v582_v50 = vadd.f32 0.00028619796, %v581_v41  ;;  %v634_v5 = vmul.f32 %v633_v60, %v1224_v37 }
  0xbd   : > { %v628_v45 = vadd.f32 0.18741608, %v627_v25  ;;  %v543_v46 = vmul.f32 %v542_v38, %v1262_v11  ;;  %v467_v55 = vmul.f32 %v466_v35, %v1236_v44  ;;  %v674_v10 = vmul.f32 %v673_v1, %v1230_v40 }
  0xbe   : > { %v668_v54 = vadd.f32 0.18741608, %v667_v33  ;;  %v507_v22 = vmul.f32 %v506_v39, %v1239_v47  ;;  %v583_v58 = vmul.f32 %v582_v50, %v1270_v28  ;;  %v635_v14 = vadd.f32 0.014752088, %v634_v5 }
  0xbf   : > { %v544_v56 = vadd.f32 0.0036580483, %v543_v46  ;;  %v629_v24 = vmul.f32 %v628_v45, %v1224_v37  ;;  %v468_v7 = vadd.f32 0.18741608, %v467_v55  ;;  %v552_v16 = vmul.f32 3.8918573e-05, %v1262_v11 }
  0xc0   : > { %v584_v4 = vadd.f32 0.0036580483, %v583_v58  ;;  %v669_v6 = vmul.f32 %v668_v54, %v1230_v40  ;;  %v508_v12 = vadd.f32 0.18741608, %v507_v22  ;;  %v675_v51 = vadd.f32 0.014752088, %v674_v10 }
  0xc1   : > { %v545_v0 = vmul.f32 %v544_v56, %v1262_v11  ;;  %v630_v18 = vadd.f32 1.1283791, %v629_v24  ;;  %v592_v21 = vmul.f32 3.8918573e-05, %v1270_v28  ;;  %v636_v25 = vmul.f32 %v635_v14, %v1224_v37 }
  0xc2   : > { %v585_v13 = vmul.f32 %v584_v4, %v1270_v28  ;;  %v553_v33 = vadd.f32 0.001143296, %v552_v16  ;;  %v472_v35 = vmul.f32 3.8918573e-05, %v1236_v44  ;;  %v676_v39 = vmul.f32 %v675_v51, %v1230_v40 }
  0xc3   : > { %v546_v9 = vadd.f32 0.05243302, %v545_v0  ;;  %v593_v41 = vadd.f32 0.001143296, %v592_v21  ;;  %v512_v42 = vmul.f32 3.8918573e-05, %v1239_v47  ;;  %v469_v52 = vmul.f32 %v468_v7, %v1236_v44 }
  0xc4   : > { %v586_v23 = vadd.f32 0.05243302, %v585_v13  ;;  %v637_v46 = vadd.f32 0.112945676, %v636_v25  ;;  %v554_v48 = vmul.f32 %v553_v33, %v1262_v11  ;;  %v473_v50 = vadd.f32 0.001143296, %v472_v35 }
  0xc5   : > { %v547_v20 = vmul.f32 %v546_v9, %v1262_v11  ;;  %v677_v54 = vadd.f32 0.112945676, %v676_v39  ;;  %v594_v55 = vmul.f32 %v593_v41, %v1270_v28  ;;  %v513_v56 = vadd.f32 0.001143296, %v512_v42 }
  0xc6   : > { %v587_v45 = vmul.f32 %v586_v23, %v1270_v28  ;;  %v638_v22 = vmul.f32 %v637_v46, %v1224_v37  ;;  %v555_v58 = vadd.f32 0.014752088, %v554_v48  ;;  %v474_v60 = vmul.f32 %v473_v50, %v1236_v44 }
  0xc7   : > { %v548_v38 = vadd.f32 0.18741608, %v547_v20  ;;  %v509_v24 = vmul.f32 %v508_v12, %v1239_v47  ;;  %v678_v0 = vmul.f32 %v677_v54, %v1230_v40  ;;  %v595_v1 = vadd.f32 0.014752088, %v594_v55 }
  0xc8   : > { %v588_v57 = vadd.f32 0.18741608, %v587_v45  ;;  %v514_v4 = vmul.f32 %v513_v56, %v1239_v47  ;;  %v639_v7 = vadd.f32 0.4994258, %v638_v22  ;;  %v556_v9 = vmul.f32 %v555_v58, %v1262_v11 }
  0xc9   : > { %v549_v5 = vmul.f32 %v548_v38, %v1262_v11  ;;  %v475_v10 = vadd.f32 0.014752088, %v474_v60  ;;  %v670_v13 = vadd.f32 1.1283791, %v669_v6  ;;  %v679_v14 = vadd.f32 0.4994258, %v678_v0 }
  0xca   : > { %v596_v16 = vmul.f32 %v595_v1, %v1270_v28  ;;  %v515_v20 = vadd.f32 0.014752088, %v514_v4  ;;  %v589_v51 = vmul.f32 %v588_v57, %v1270_v28  ;;  %v640_v12 = vmul.f32 %v639_v7, %v1224_v37 }
  0xcb   : > { %v557_v21 = vadd.f32 0.112945676, %v556_v9  ;;  %v476_v23 = vmul.f32 %v475_v10, %v1236_v44  ;;  %v470_v25 = vadd.f32 1.1283791, %v469_v52  ;;  %v680_v33 = vmul.f32 %v679_v14, %v1230_v40 }
  0xcc   : > { %v597_v35 = vadd.f32 0.112945676, %v596_v16  ;;  %v516_v38 = vmul.f32 %v515_v20, %v1239_v47  ;;  %v510_v39 = vadd.f32 1.1283791, %v509_v24  ;;  %v550_v41 = vadd.f32 1.1283791, %v549_v5 }
  0xcd   : > { %v1327_v6 = vadd.f32 1.0, %v640_v12  ;;  %v558_v42 = vmul.f32 %v557_v21, %v1262_v11  ;;  %v1330_v45 = vadd.f32 1.0, %v680_v33  ;;  %v477_v37 = vadd.f32 0.112945676, %v476_v23 }
  0xce   : > { %v598_v46 = vmul.f32 %v597_v35, %v1270_v28  ;;  %v517_v48 = vadd.f32 0.112945676, %v516_v38  ;;  %v1334_v50 = vmul.f32 %v630_v18, %v1200_v26  ;;  %v1337_v40 = vmul.f32 0.5, %v1246_v59 }
  0xcf   : > { %v590_v52 = vadd.f32 1.1283791, %v589_v51  ;;  %963 = vrcp.f32 %v1327_v6  ;;  %v1341_v54 = vmul.f32 %v670_v13, %v1208_v30  ;;  %v1344_v55 = vmul.f32 %v470_v25, %v1217_v34 }
  0xd0   : > { %965 = vrcp.f32 %v1330_v45  ;;  %v393_v56 = vadd.f32 0.001143296, %v1289_v61  ;;  %v1349_v57 = vmul.f32 %v510_v39, %v1222_v36  ;;  %v1352_v26 = vmul.f32 %v550_v41, %v1249_v62 }
  0xd1   : > { %v559_v59 = vadd.f32 0.4994258, %v558_v42  ;;  %v599_v18 = vadd.f32 0.4994258, %v598_v46  ;;  %v651_v22 = vand.u32 2147483647, %v1327_v6  ;;  %v478_v58 = vmul.f32 %v477_v37, %v1236_v44 }
  0xd2   : > { %v653_v30 = vand.u32 2147483648, %v1327_v6  ;;  %v518_v34 = vmul.f32 %v517_v48, %v1239_v47  ;;  %v1359_v60 = vmul.f32 %v590_v52, %v1259_v8  ;;  %v691_v61 = vand.u32 2147483647, %v1330_v45 }
  0xd3   : > { %v560_v36 = vmul.f32 %v559_v59, %v1262_v11  ;;  %v600_v62 = vmul.f32 %v599_v18, %v1270_v28  ;;  %vm647_vm2 = vweird.f32 %v1327_v6  ;;  %v479_v24 = vadd.f32 0.4994258, %v478_v58 }
  0xd4   : > { %v519_v0 = vadd.f32 0.4994258, %v518_v34  ;;  %v394_v1 = vmul.f32 %v393_v56, %v1212_v32  ;;  %vm687_vm3 = vweird.f32 %v1330_v45  ;;  %v693_v5 = vand.u32 2147483648, %v1330_v45 }
  0xd5   : > { %v964_v4 = vpop.eup %963  ;;  %v1368_v7 = vadd.f32 1.0, %v560_v36  ;;  %v1370_v8 = vadd.f32 1.0, %v600_v62  ;;  %vm1373_vm4 = vcmp.eq.f32.partialorder %v651_v22, 8.507059e+37  ;;  %v654_v10 = vor.u32 1.1754944e-38, %v653_v30 }
  0xd6   : > { %v966_v9 = vpop.eup %965  ;;  %v643_v11 = vmul.f32 %v964_v4, %v1327_v6  ;;  %v480_v13 = vmul.f32 %v479_v24, %v1236_v44  ;;  %vm1379_vm5 = vcmp.eq.f32.partialorder %v691_v61, 8.507059e+37  ;;  %v520_v20 = vmul.f32 %v519_v0, %v1239_v47 }
  0xd7   : > { %v683_v14 = vmul.f32 %v966_v9, %v1330_v45  ;;  %967 = vrcp.f32 %v1368_v7  ;;  %v395_v12 = vadd.f32 0.014752088, %v394_v1  ;;  %v432_v21 = vmul.f32 3.8918573e-05, %v1242_v53 }
  0xd8   : > { %v644_v51 = vsub.f32 1.0, %v643_v11  ;;  %969 = vrcp.f32 %v1370_v8  ;;  %vm648_vm6 = vweird.f32 %v964_v4  ;;  %v694_v25 = vor.u32 1.1754944e-38, %v693_v5 }
  0xd9   : > { %v684_v23 = vsub.f32 1.0, %v683_v14  ;;  %v571_v44 = vand.u32 2147483647, %v1368_v7  ;;  %v573_v35 = vand.u32 2147483648, %v1368_v7  ;;  %v613_v38 = vand.u32 2147483648, %v1370_v8  ;;  %vm649_vm8 = vmor %vm647_vm2, %vm648_vm6 }
  0xda   : > { %v645_v33 = vmul.f32 %v964_v4, %v644_v51  ;;  %v1390_v39 = vadd.f32 1.0, %v480_v13  ;;  %vm688_vm7 = vweird.f32 %v966_v9  ;;  %v611_v47 = vand.u32 2147483647, %v1370_v8 }
  0xdb   : > { %v685_v41 = vmul.f32 %v966_v9, %v684_v23  ;;  %v1393_v42 = vadd.f32 1.0, %v520_v20  ;;  %v396_v37 = vmul.f32 %v395_v12, %v1212_v32  ;;  %v433_v48 = vadd.f32 0.001143296, %v432_v21  ;;  %vm689_vm11 = vmor %vm687_vm3, %vm688_vm7 }
  0xdc   : > { %v646_v46 = vadd.f32 %v964_v4, %v645_v33  ;;  %971 = vrcp.f32 %v1390_v39  ;;  %vm567_vm9 = vweird.f32 %v1368_v7  ;;  %vm607_vm10 = vweird.f32 %v1370_v8 }
  0xdd   : > { %v968_v52 = vpop.eup %967  ;;  %v686_v56 = vadd.f32 %v966_v9, %v685_v41  ;;  %973 = vrcp.f32 %v1393_v42  ;;  %vm1407_vm12 = vcmp.eq.f32.partialorder %v571_v44, 8.507059e+37  ;;  %v574_v6 = vor.u32 1.1754944e-38, %v573_v35 }
  0xde   : > { %v970_v59 = vpop.eup %969  ;;  %v650_v18 = vsel %vm649_vm8, %v964_v4, %v646_v46  ;;  %v563_v22 = vmul.f32 %v968_v52, %v1368_v7  ;;  %v614_v58 = vor.u32 1.1754944e-38, %v613_v38  ;;  %vm1414_vm13 = vcmp.eq.f32.partialorder %v611_v47, 8.507059e+37 }
  0xdf   : > { %v655_v34 = vsel %vm1373_vm4, %v654_v10, %v650_v18  ;;  %v690_v61 = vsel %vm689_vm11, %v966_v9, %v686_v56  ;;  %v603_v36 = vmul.f32 %v970_v59, %v1370_v8  ;;  %v491_v45 = vand.u32 2147483647, %v1390_v39 }
  0xe0   : > { %v656_v24 = vmul.f32 %v655_v34, %v1334_v50  ;;  %v695_v0 = vsel %vm1379_vm5, %v694_v25, %v690_v61  ;;  %v564_v1 = vsub.f32 1.0, %v563_v22  ;;  %v493_v4 = vand.u32 2147483648, %v1390_v39 }
  0xe1   : > { %v696_v5 = vmul.f32 %v695_v0, %v1341_v54  ;;  %vm568_vm14 = vweird.f32 %v968_v52  ;;  %v604_v9 = vsub.f32 1.0, %v603_v36  ;;  %vm608_vm15 = vweird.f32 %v970_v59 }
  0xe2   : > { %vm487_vm1 = vweird.f32 %v1390_v39  ;;  %v972_v11 = vpop.eup %971  ;;  %v891_v28 = vclamps-f32 %v656_v24, 1.0  ;;  %v565_v10 = vmul.f32 %v968_v52, %v564_v1  ;;  %vm527_vm2 = vweird.f32 %v1393_v42  ;;  %vm569_vm4 = vmor %vm567_vm9, %vm568_vm14 }
  0xe3   : > { %v531_v50 = vand.u32 2147483647, %v1393_v42  ;;  %v533_v13 = vand.u32 2147483648, %v1393_v42  ;;  %v974_v14 = vpop.eup %973  ;;  %v892_v16 = vclamps-f32 %v696_v5, 1.0  ;;  %v605_v20 = vmul.f32 %v970_v59, %v604_v9  ;;  %vm609_vm6 = vmor %vm607_vm10, %vm608_vm15 }
  0xe4   : > { %v483_v51 = vmul.f32 %v972_v11, %v1390_v39  ;;  %vm1429_vm3 = vcmp.eq.f32.partialorder %v491_v45, 8.507059e+37  ;;  %v397_v12 = vadd.f32 0.112945676, %v396_v37  ;;  %v705_v21 = vadd.f32 1.0, %v891_v28 }
  0xe5   : > { %v566_v23 = vadd.f32 %v968_v52, %v565_v10  ;;  %v523_v25 = vmul.f32 %v974_v14, %v1393_v42  ;;  %v434_v44 = vmul.f32 %v433_v48, %v1242_v53  ;;  %v706_v33 = vadd.f32 1.0, %v892_v16 }
  0xe6   : > { %v606_v35 = vadd.f32 %v970_v59, %v605_v20  ;;  %v484_v38 = vsub.f32 1.0, %v483_v51  ;;  %vm488_vm5 = vweird.f32 %v972_v11  ;;  %v713_v41 = vmul.f32 %v705_v21, %v1276_v43 }
  0xe7   : > { %v570_v47 = vsel %vm569_vm4, %v968_v52, %v566_v23  ;;  %v524_v46 = vsub.f32 1.0, %v523_v25  ;;  %vm528_vm7 = vweird.f32 %v974_v14  ;;  %v714_v37 = vmul.f32 %v706_v33, %v1281_v49  ;;  %vm489_vm8 = vmor %vm487_vm1, %vm488_vm5 }
  0xe8   : > { %v575_v48 = vsel %vm1407_vm12, %v574_v6, %v570_v47  ;;  %v610_v56 = vsel %vm609_vm6, %v970_v59, %v606_v35  ;;  %v485_v7 = vmul.f32 %v972_v11, %v484_v38  ;;  %738 = vmatpush.msrb.mxu2 %v713_v41  ;;  %v398_v22 = vmul.f32 %v397_v12, %v1212_v32  ;;  %vm529_vm10 = vmor %vm527_vm2, %vm528_vm7 }
  0xe9   : > { %v576_v18 = vmul.f32 %v575_v48, %v1352_v26  ;;  %v615_v43 = vsel %vm1414_vm13, %v614_v58, %v610_v56  ;;  %v525_v52 = vmul.f32 %v974_v14, %v524_v46  ;;  %758 = vmatpush.msrb.mxu3 %v714_v37  ;;  %v494_v61 = vor.u32 1.1754944e-38, %v493_v4 }
  0xea   : > { %v616_v8 = vmul.f32 %v615_v43, %v1359_v60  ;;  %v486_v34 = vadd.f32 %v972_v11, %v485_v7  ;;  %v435_v49 = vadd.f32 0.014752088, %v434_v44  ;;  %vm532_vm9 = vcmp.eq.f32.partialorder %v531_v50, 8.507059e+37 }
  0xeb   : > { %v889_v36 = vclamps-f32 %v576_v18, 1.0  ;;  %v526_v59 = vadd.f32 %v974_v14, %v525_v52  ;;  %v399_v26 = vadd.f32 0.4994258, %v398_v22  ;;  %v534_v58 = vor.u32 1.1754944e-38, %v533_v13 }
  0xec   : > { %v890_v30 = vclamps-f32 %v616_v8, 1.0  ;;  %v490_v6 = vsel %vm489_vm8, %v972_v11, %v486_v34  ;;  %v436_v60 = vmul.f32 %v435_v49, %v1242_v53  ;;  %v425_v9 = vmul.f32 %v1291_v63, %v1242_v53 }
  0xed   : > { %v703_v62 = vadd.f32 1.0, %v889_v36  ;;  %v495_v45 = vsel %vm1429_vm3, %v494_v61, %v490_v6  ;;  %v530_v24 = vsel %vm529_vm10, %v974_v14, %v526_v59  ;;  %v400_v39 = vmul.f32 %v399_v26, %v1212_v32 }
  0xee   : > { %v704_v0 = vadd.f32 1.0, %v890_v30  ;;  %v496_v1 = vmul.f32 %v495_v45, %v1344_v55  ;;  %v535_v4 = vsel %vm532_vm9, %v534_v58, %v530_v24  ;;  %v437_v5 = vadd.f32 0.112945676, %v436_v60  ;;  %v715_v45 = vld [vmem:[%s1526_s3] sm:$0xf] }
  0xef   : > { %v711_v42 = vmul.f32 %v703_v62, %v1297_v3  ;;  %v536_v11 = vmul.f32 %v535_v4, %v1349_v57  ;;  %v401_v28 = vadd.f32 1.0, %v400_v39  ;;  %v387_v10 = vmul.f32 %v1295_v2, %v1212_v32  ;;  %v716_v2 = vld [vmem:[%s1527_s4] sm:$0xf] }
  0xf0   : > { %v712_v50 = vmul.f32 %v704_v0, %v1337_v40  ;;  %v887_v13 = vclamps-f32 %v496_v1, 1.0  ;;  %v438_v14 = vmul.f32 %v437_v5, %v1242_v53  ;;  %v365_v16 = vmul.f32 0.5, %v1202_v27  ;;  %719 = vperm.xlu2 %962, %v716_v2  }
  0xf1   : > { %739 = vmatpush.msrb.mxu2 %v711_v42  ;;  %v888_v55 = vclamps-f32 %v536_v11, 1.0  ;;  %975 = vrcp.f32 %v401_v28  ;;  %v426_v3 = vadd.f32 0.05243302, %v425_v9  ;;  %v366_v57 = vmul.f32 0.5, %v1210_v31 }
  0xf2   : > { %759 = vmatpush.msrb.mxu3 %v712_v50  ;;  %v701_v63 = vadd.f32 1.0, %v887_v13  ;;  %v439_v20 = vadd.f32 0.4994258, %v438_v14  ;;  %v388_v40 = vadd.f32 0.18741608, %v387_v10  ;;  %v413_v38 = vand.u32 2147483648, %v401_v28 }
  0xf3   : > { %v702_v51 = vadd.f32 1.0, %v888_v55  ;;  %v427_v25 = vmul.f32 %v426_v3, %v1242_v53  ;;  %v411_v46 = vand.u32 2147483647, %v401_v28  ;;  %vm407_vm12 = vweird.f32 %v401_v28 }
  0xf4   : > { %v709_v54 = vmul.f32 %v701_v63, %v365_v16  ;;  %v440_v12 = vmul.f32 %v439_v20, %v1242_v53  ;;  %v389_v44 = vmul.f32 %v388_v40, %v1212_v32  ;;  %v414_v7 = vor.u32 1.1754944e-38, %v413_v38 }
  0xf5   : > { %v710_v21 = vmul.f32 %v702_v51, %v366_v57  ;;  %v428_v35 = vadd.f32 0.18741608, %v427_v25  ;;  %vm412_vm14 = vcmp.eq.f32.partialorder %v411_v46, 8.507059e+37  ;;  %vm722_vm4 = vcmask 261120  }
  0xf6   : > { %740 = vmatpush.msrb.mxu2 %v709_v54  ;;  %v441_v23 = vadd.f32 1.0, %v440_v12  ;;  %v390_v41 = vadd.f32 1.1283791, %v389_v44 }
  0xf7   : > { %v976_v27 = vpop.eup %975  ;;  %760 = vmatpush.msrb.mxu3 %v710_v21  ;;  %v429_v56 = vmul.f32 %v428_v35, %v1242_v53  ;;  %v363_v53 = vmul.f32 0.5, %v1186_v15  ;;  %v364_v15 = vmul.f32 0.5, %v1191_v19 }
  0xf8   : > { %v403_v31 = vmul.f32 %v976_v27, %v401_v28  ;;  %977 = vrcp.f32 %v441_v23  ;;  %vm408_vm11 = vweird.f32 %v976_v27  ;;  %v391_v43 = vmul.f32 %v390_v41, %v1189_v17 }
  0xf9   : > { %vm409_vm13 = vmor %vm407_vm12, %vm408_vm11  ;;  %v453_v34 = vand.u32 2147483648, %v441_v23  ;;  %v430_v61 = vadd.f32 1.1283791, %v429_v56  ;;  %v451_v36 = vand.u32 2147483647, %v441_v23  ;;  %vm447_vm1 = vweird.f32 %v441_v23 }
  0xfa   : > { %v404_v33 = vsub.f32 1.0, %v403_v31 }
  0xfb   : > { %v454_v6 = vor.u32 1.1754944e-38, %v453_v34  ;;  %v431_v17 = vmul.f32 %v430_v61, %v1205_v29  ;;  %vm452_vm3 = vcmp.eq.f32.partialorder %v451_v36, 8.507059e+37 }
  0xfc   : > { %v405_v47 = vmul.f32 %v976_v27, %v404_v33 }
  0xfe   : > { %v978_v37 = vpop.eup %977  ;;  %v406_v48 = vadd.f32 %v976_v27, %v405_v47 }
  0xff   : > { %v443_v18 = vmul.f32 %v978_v37, %v441_v23  ;;  %vm448_vm15 = vweird.f32 %v978_v37 }
 0x100   : > { %v410_v32 = vsel %vm409_vm13, %v976_v27, %v406_v48  ;;  %vm449_vm2 = vmor %vm447_vm1, %vm448_vm15 }
 0x101   : > { %v415_v52 = vsel %vm412_vm14, %v414_v7, %v410_v32  ;;  %v444_v22 = vsub.f32 1.0, %v443_v18 }
 0x102   : > { %v416_v8 = vmul.f32 %v415_v52, %v391_v43 }
 0x103   : > { %v445_v49 = vmul.f32 %v978_v37, %v444_v22 }
 0x104   : > { %v885_v59 = vclamps-f32 %v416_v8, 1.0 }
 0x105   : > { %v446_v26 = vadd.f32 %v978_v37, %v445_v49 }
 0x106   : > { %v699_v30 = vadd.f32 1.0, %v885_v59 }
 0x107   : > { %v450_v58 = vsel %vm449_vm2, %v978_v37, %v446_v26 }
 0x108   : > { %v707_v60 = vmul.f32 %v699_v30, %v363_v53  ;;  %v455_v62 = vsel %vm452_vm3, %v454_v6, %v450_v58 }
 0x109   : > { %v456_v24 = vmul.f32 %v455_v62, %v431_v17 }
 0x10a   : > { %741 = vmatpush.msrb.mxu2 %v707_v60 }
 0x10b   : > { %v886_v39 = vclamps-f32 %v456_v24, 1.0  ;;  %893 = vmatmul.msk.f32.vlgmr.msrb.gmra.mxu2 %vm722_vm4, %v715_v45 }
 0x10d   : > { %v700_v0 = vadd.f32 1.0, %v886_v39 }
 0x10f   : > { %v708_v1 = vmul.f32 %v700_v0, %v364_v15 }
 0x111   : > { %761 = vmatpush.msrb.mxu3 %v708_v1 }
 0x112   : > { %894 = vmatmul.msk.f32.vlgmr.msrb.gmra.mxu3 %vm722_vm4, %v715_v45 }
 0x14a   : > { %v720_v29 = vpop.permute.xlu2 %719 }
 0x18e   : > { %v743_v5 = vpop.f32.mrf.mxu2 }
 0x18f   : > { %v744_v42 = vadd.f32 %v743_v5, %v720_v29 }
 0x195   : > { %v763_v4 = vpop.f32.mrf.mxu3 }
 0x196   : > { %v764_v9 = vadd.f32 %v763_v4, %v720_v29 }
 0x198   : > { %v768_v19 = vrot.slane %v764_v9, 4 }
 0x19a   : > { %v769_v11 = vsel %vm300_vm0, %v744_v42, %v768_v19 }
 0x19b   : > { %771 = vst [vmem:[%s242_s8] sm:$0xff] %v769_v11 }
 0x19c   : > { %1006 = shalt.err (!%p1003_p5)
}
 0x19d   : > { %904 = dma.vmem_to_hbm [thread:$0]  (%p1130_p4), %s789_s9, 128, %s791_s10, %s773_s21  }
 0x19e PF: > { %p910_p6 = scmp.ge.s32.totalorder %s1057_s23, 2  ;;  %s802_s17 = sand.u32 1, %s1037_s18  }
 0x19f   : > { %s803_s25 = scalar_lea.sflag [#allocation3], %s802_s17 }
 0x1a0   : > { %p907_p7 = pnand %p910_p6, %p1137_p8 }
 0x1a2   : > { %p908_p9 = pneg %p907_p7 }
 0x1a4   : > { %1032 = dma.done.wait (%p908_p9), %s803_s25, 128  }
 0x1a5   : > { %1034 = vsyncadd (%p908_p9), %s803_s25, 4294967168  ;;  %s18_s23 = sadd.s32 1, %s1057_s23   ;;  %s1541_s18 = smov %s1041_s19 }
 0x1a6   : > { %p15_p10 = scmp.ge.s32.totalorder %s18_s23, 4   ;;  %s1542_s19 = smov %s1045_s20 }
 0x1a7   : > { %s1543_s20 = smov %s1143_s6  ;;  %s1544_s21 = smov %s1053_s22 }
 0x1a8   : > { %s1545_s22 = smov %s1547_s26  ;;  %17 = sbr.rel (!%p15_p10) target bundleno = 4 (0x4), region = 75 }
 0x1ad   :  { %809 = vsyncpa [#allocation3], 1 }
 0x1ae   :  { %811 = vsyncpa [#allocation3 + $0x1], 1 }

</bundles_post_ra>
